<compile_context>
chip_gen: v5e
topology: v5e:2x2
jax: 0.10.0
libtpu: 0.0.40
codegen_flags: <defaults>
</compile_context>

<pallas_src>
import functools

import jax
import jax.numpy as jnp
import numpy as np
from jax.experimental import pallas as pl
from jax.experimental.pallas import tpu as pltpu

LANES = 128                      # padded width for hidden / class / feature dims
TM = 256                         # aggregate node-row tile (256-tall MXU on v6e/v7x)
_VMEM_LIMIT = 48 * 1024 * 1024   # explicit cap, safely under v7x 64 MiB physical


def _round_up(x, m):
    return ((x + m - 1) // m) * m


def _transform_row_tile(npad, fpad):
    """Row tile for the feature transform: one grid step when padded X fits
    comfortably in VMEM (Cora-scale), else the largest tile dividing npad."""
    if npad * fpad * 2 <= 16 * 1024 * 1024:   # bf16 X bytes
        return npad
    for t in (4096, 2048, 1024, 512, 256):
        if npad % t == 0:
            return t
    return TM


# --------------------------------------------------------------------------
# Kernels
# --------------------------------------------------------------------------
def _transform_kernel(x_ref, w_ref, out_ref):
    """XW = X_tile @ W  (bf16 operands, f32 accumulate, lane-dense bf16 output)."""
    out_ref[...] = jnp.dot(
        x_ref[...], w_ref[...], preferred_element_type=jnp.float32
    ).astype(out_ref.dtype)


def _fused_layer1_kernel(a_ref, xw_ref, b_ref, w2_ref, out_ref):
    """HW2_tile = relu(A_panel @ XW1 + b1) @ W2.

    Fuses the layer-2 feature transform into the layer-1 aggregate so the f32
    hidden activation H never leaves VMEM. bf16 MXU operands, f32 accumulate.
    """
    h = jnp.dot(a_ref[...], xw_ref[...], preferred_element_type=jnp.float32)
    h = jnp.maximum(h + b_ref[...], 0.0)
    out_ref[...] = jnp.dot(
        h.astype(jnp.bfloat16), w2_ref[...], preferred_element_type=jnp.float32
    ).astype(out_ref.dtype)


def _aggregate_kernel(a_ref, xw_ref, b_ref, out_ref):
    """out_tile = A_panel @ HW2 + b.  bf16 operands, f32 accumulate."""
    acc = jnp.dot(a_ref[...], xw_ref[...], preferred_element_type=jnp.float32)
    out_ref[...] = (acc + b_ref[...]).astype(out_ref.dtype)


# --------------------------------------------------------------------------
# Pallas wrappers
# --------------------------------------------------------------------------
def feature_transform(x, w, out_dtype=jnp.bfloat16):
    """Row-tiled X @ W -> [N, K] in `out_dtype` (K is a multiple of 128)."""
    n, f = x.shape
    k = w.shape[1]
    tile = _transform_row_tile(n, f)
    flops = 2 * n * f * k
    bytes_accessed = (
        n * f * x.dtype.itemsize
        + f * k * w.dtype.itemsize
        + n * k * np.dtype(out_dtype).itemsize
    )
    return pl.pallas_call(
        _transform_kernel,
        out_shape=jax.ShapeDtypeStruct((n, k), out_dtype),
        grid_spec=pl.GridSpec(
            grid=(n // tile,),
            in_specs=[
                pl.BlockSpec((tile, f), lambda i: (i, 0)),   # X row tile (bf16)
                pl.BlockSpec((f, k), lambda i: (0, 0)),      # W (resident)
            ],
            out_specs=pl.BlockSpec((tile, k), lambda i: (i, 0)),
        ),
        compiler_params=pltpu.CompilerParams(
            dimension_semantics=("parallel",),
            vmem_limit_bytes=_VMEM_LIMIT,
        ),
        cost_estimate=pl.CostEstimate(
            flops=flops, transcendentals=0, bytes_accessed=bytes_accessed
        ),
    )(x, w)


def fused_layer1(a_pad, xw1, b1, w2, out_dtype=jnp.bfloat16):
    """HW2 = relu(A_hat @ XW1 + b1) @ W2, row-tiled over A_hat panels.

    A_hat panels are software-pipelined; XW1, b1, W2 are resident across steps.
    """
    n = a_pad.shape[0]
    k = xw1.shape[1]
    flops = 2 * n * n * k + 2 * n * k * k
    bytes_accessed = (
        n * n * a_pad.dtype.itemsize
        + n * k * xw1.dtype.itemsize
        + k * b1.dtype.itemsize
        + k * k * w2.dtype.itemsize
        + n * k * np.dtype(out_dtype).itemsize
    )
    return pl.pallas_call(
        _fused_layer1_kernel,
        out_shape=jax.ShapeDtypeStruct((n, k), out_dtype),
        grid_spec=pl.GridSpec(
            grid=(n // TM,),
            in_specs=[
                pl.BlockSpec((TM, n), lambda i: (i, 0)),   # A_hat row panel
                pl.BlockSpec((n, k), lambda i: (0, 0)),    # XW1 (resident)
                pl.BlockSpec((1, k), lambda i: (0, 0)),    # b1 (resident)
                pl.BlockSpec((k, k), lambda i: (0, 0)),    # W2 (resident)
            ],
            out_specs=pl.BlockSpec((TM, k), lambda i: (i, 0)),
        ),
        compiler_params=pltpu.CompilerParams(
            dimension_semantics=("parallel",),
            vmem_limit_bytes=_VMEM_LIMIT,
        ),
        cost_estimate=pl.CostEstimate(
            flops=flops, transcendentals=0, bytes_accessed=bytes_accessed
        ),
    )(a_pad, xw1, b1, w2)


def aggregate(a_pad, xw, b, out_dtype=jnp.float32):
    """Row-tiled A_hat @ XW + b. A_hat panels pipelined, XW / bias resident."""
    n = a_pad.shape[0]
    k = xw.shape[1]
    flops = 2 * n * n * k
    bytes_accessed = (
        n * n * a_pad.dtype.itemsize
        + n * k * xw.dtype.itemsize
        + k * b.dtype.itemsize
        + n * k * np.dtype(out_dtype).itemsize
    )
    return pl.pallas_call(
        _aggregate_kernel,
        out_shape=jax.ShapeDtypeStruct((n, k), out_dtype),
        grid_spec=pl.GridSpec(
            grid=(n // TM,),
            in_specs=[
                pl.BlockSpec((TM, n), lambda i: (i, 0)),   # A_hat row panel
                pl.BlockSpec((n, k), lambda i: (0, 0)),    # XW (resident)
                pl.BlockSpec((1, k), lambda i: (0, 0)),    # bias (resident)
            ],
            out_specs=pl.BlockSpec((TM, k), lambda i: (i, 0)),
        ),
        compiler_params=pltpu.CompilerParams(
            dimension_semantics=("parallel",),
            vmem_limit_bytes=_VMEM_LIMIT,
        ),
        cost_estimate=pl.CostEstimate(
            flops=flops, transcendentals=0, bytes_accessed=bytes_accessed
        ),
    )(a_pad, xw, b)


# --------------------------------------------------------------------------
# Full forward pass
# --------------------------------------------------------------------------
def pad_adjacency(a_hat):
    """Pad dense A_hat to a multiple of TM and cast to bf16. Do this ONCE per
    graph (outside the jitted forward) — A_hat is static across inference calls."""
    n = a_hat.shape[0]
    npad = _round_up(n, TM)
    return jnp.zeros((npad, npad), jnp.bfloat16).at[:n, :n].set(
        a_hat.astype(jnp.bfloat16)
    )


@jax.jit
def gcn_forward(a_pad, x, w1, b1, w2, b2):
    """2-layer GCN forward.

    a_pad: pre-padded bf16 normalized adjacency [npad, npad] (see pad_adjacency).
    Pads feature dims to 128 lanes, runs lane-dense bf16 Pallas kernels with f32
    accumulation, then slices the real [N, C] logits back out.
    """
    npad = a_pad.shape[0]
    n, f = x.shape
    fpad = _round_up(f, LANES)
    hid = w1.shape[1]
    c = w2.shape[1]

    # Zero-pad node rows and feature/class dims (padded rows/cols never
    # contaminate the real [:n, :c] outputs: A_hat columns for padded nodes are
    # zero, and padded W/b columns are zero).
    x_p = jnp.zeros((npad, fpad), jnp.bfloat16).at[:n, :f].set(x.astype(jnp.bfloat16))
    w1_p = jnp.zeros((fpad, LANES), jnp.bfloat16).at[:f, :hid].set(w1.astype(jnp.bfloat16))
    b1_p = jnp.zeros((1, LANES), jnp.float32).at[:, :hid].set(b1)
    w2_p = jnp.zeros((LANES, LANES), jnp.bfloat16).at[:hid, :c].set(w2.astype(jnp.bfloat16))
    b2_p = jnp.zeros((1, LANES), jnp.float32).at[:, :c].set(b2)

    # Layer 1 transform:      XW1 = X @ W1
    xw1 = feature_transform(x_p, w1_p)                     # bf16 [npad, 128]
    # Layer 1 agg + layer 2 transform (fused):
    #                         HW2 = relu(A_hat @ XW1 + b1) @ W2
    hw2 = fused_layer1(a_pad, xw1, b1_p, w2_p)             # bf16 [npad, 128]
    # Layer 2 agg:            out = A_hat @ HW2 + b2
    out = aggregate(a_pad, hw2, b2_p, out_dtype=jnp.float32)

    return out[:n, :c]


# --------------------------------------------------------------------------
# Graph / parameter helpers (plain-JAX glue)
# --------------------------------------------------------------------------
def build_normalized_adjacency(edge_index, num_nodes):
    """Dense A_hat = D^-1/2 (A + I) D^-1/2, matching PyG gcn_norm with self-loops.
    edge_index: int32 [2, E], row 0 = source j, row 1 = target i."""
    src, dst = edge_index[0], edge_index[1]
    loop = jnp.arange(num_nodes, dtype=edge_index.dtype)
    src = jnp.concatenate([src, loop])
    dst = jnp.concatenate([dst, loop])
    ones = jnp.ones(src.shape[0], jnp.float32)
    deg = jnp.zeros((num_nodes,), jnp.float32).at[dst].add(ones)
    dinv_sqrt = jnp.where(deg > 0, jax.lax.rsqrt(deg), 0.0)
    norm = dinv_sqrt[src] * dinv_sqrt[dst]
    a_hat = jnp.zeros((num_nodes, num_nodes), jnp.float32).at[dst, src].add(norm)
    return a_hat


def glorot(key, shape):
    fan_in, fan_out = shape
    limit = jnp.sqrt(6.0 / (fan_in + fan_out))
    return jax.random.uniform(key, shape, jnp.float32, -limit, limit)


if __name__ == "__main__":
    # Small synthetic graph consistent with the module's forward.
    N = 128            # num nodes
    F = 32             # num_node_features
    HID = 16           # hidden_dim
    C = 8              # num_classes

    key = jax.random.PRNGKey(0)
    kx, ks, kd, kw1, kw2 = jax.random.split(key, 5)

    x = jax.random.normal(kx, (N, F), jnp.float32)

    # Deterministic random undirected edge set.
    E = 256
    src = jax.random.randint(ks, (E,), 0, N, dtype=jnp.int32)
    dst = jax.random.randint(kd, (E,), 0, N, dtype=jnp.int32)
    edge_index = jnp.stack(
        [jnp.concatenate([src, dst]), jnp.concatenate([dst, src])]
    )  # [2, 2E], symmetric

    # Parameters (GCNConv: glorot weight, zero bias). Dropout = identity in eval.
    w1 = glorot(kw1, (F, HID))
    b1 = jnp.zeros((1, HID), jnp.float32)
    w2 = glorot(kw2, (HID, C))
    b2 = jnp.zeros((1, C), jnp.float32)

    a_hat = build_normalized_adjacency(edge_index, N)
    a_pad = pad_adjacency(a_hat)   # once per graph, outside the jitted forward

    out = gcn_forward(a_pad, x, w1, b1, w2, b2)
    jax.block_until_ready(out)

    # Sanity check against a pure-f32 plain-JAX reference. All matmul operands
    # in the kernel are bf16 (f32 accumulation), so allow bf16-level tolerance.
    h_ref = jnp.maximum(a_hat @ (x @ w1) + b1, 0.0)
    out_ref = a_hat @ (h_ref @ w2) + b2
    assert out.shape == (N, C)
    assert jnp.allclose(out, out_ref, atol=1e-1, rtol=5e-2), (
        float(jnp.max(jnp.abs(out - out_ref)))
    )

    print("KERNEL_OK")
</pallas_src>

<mosaic_0001>
module attributes {stable_mosaic.version = 11 : i64} {
  func.func @_fused_layer1_kernel(%arg0: i32, %arg1: memref<256x256xbf16, #tpu.memory_space<vmem>>, %arg2: memref<256x128xbf16, #tpu.memory_space<vmem>>, %arg3: memref<1x128xf32, #tpu.memory_space<vmem>>, %arg4: memref<128x128xbf16, #tpu.memory_space<vmem>>, %arg5: memref<256x128xbf16, #tpu.memory_space<vmem>>) attributes {dimension_semantics = [#tpu.dimension_semantics<parallel>], iteration_bounds = array<i64: 1>, scalar_prefetch = 0 : i64, scratch_operands = 0 : i64, tpu.core_type = #tpu.core_type<tc>, window_params = [{transform_indices = @transform_0, window_bounds = array<i64: 256, 256>}, {pipeline_mode = #tpu.pipeline_mode<synchronous>, transform_indices = @transform_1, window_bounds = array<i64: 256, 128>}, {pipeline_mode = #tpu.pipeline_mode<synchronous>, transform_indices = @transform_2, window_bounds = array<i64: 1, 128>}, {pipeline_mode = #tpu.pipeline_mode<synchronous>, transform_indices = @transform_3, window_bounds = array<i64: 128, 128>}, {transform_indices = @transform_4, window_bounds = array<i64: 256, 128>}]} {
    %c0 = arith.constant 0 : index
    %c0_0 = arith.constant 0 : index
    %0 = vector.load %arg1[%c0, %c0_0] : memref<256x256xbf16, #tpu.memory_space<vmem>>, vector<256x256xbf16>
    %c0_1 = arith.constant 0 : index
    %c0_2 = arith.constant 0 : index
    %1 = vector.load %arg2[%c0_1, %c0_2] : memref<256x128xbf16, #tpu.memory_space<vmem>>, vector<256x128xbf16>
    %cst = arith.constant dense<0.000000e+00> : vector<256x128xf32>
    %2 = tpu.matmul %0, %1, %cst {dimension_numbers = #tpu.dot_dimension_numbers<[1], [0], [0], [1], [0, 0, 1, 1], [], []>} : vector<256x256xbf16>, vector<256x128xbf16>, vector<256x128xf32> -> vector<256x128xf32>
    %c0_3 = arith.constant 0 : index
    %c0_4 = arith.constant 0 : index
    %3 = vector.load %arg3[%c0_3, %c0_4] : memref<1x128xf32, #tpu.memory_space<vmem>>, vector<1x128xf32>
    %4 = vector.broadcast %3 : vector<1x128xf32> to vector<256x128xf32>
    %5 = arith.addf %2, %4 : vector<256x128xf32>
    %cst_5 = arith.constant 0.000000e+00 : f32
    %6 = vector.broadcast %cst_5 : f32 to vector<256x128xf32>
    %7 = arith.maximumf %5, %6 : vector<256x128xf32>
    %8 = arith.truncf %7 : vector<256x128xf32> to vector<256x128xbf16>
    %c0_6 = arith.constant 0 : index
    %c0_7 = arith.constant 0 : index
    %9 = vector.load %arg4[%c0_6, %c0_7] : memref<128x128xbf16, #tpu.memory_space<vmem>>, vector<128x128xbf16>
    %cst_8 = arith.constant dense<0.000000e+00> : vector<256x128xf32>
    %10 = tpu.matmul %8, %9, %cst_8 {dimension_numbers = #tpu.dot_dimension_numbers<[1], [0], [0], [1], [0, 0, 1, 1], [], []>} : vector<256x128xbf16>, vector<128x128xbf16>, vector<256x128xf32> -> vector<256x128xf32>
    %11 = arith.truncf %10 : vector<256x128xf32> to vector<256x128xbf16>
    %c0_9 = arith.constant 0 : index
    %c0_10 = arith.constant 0 : index
    %12 = vector.load %arg5[%c0_9, %c0_10] : memref<256x128xbf16, #tpu.memory_space<vmem>>, vector<256x128xbf16>
    tpu.vector_store %arg5[%c0_9, %c0_10], %11 {strides = array<i32>} : memref<256x128xbf16, #tpu.memory_space<vmem>>, vector<256x128xbf16>,
    return
  }
  func.func @transform_0(%arg0: i32) -> (i32, i32) {
    %c0_i32 = arith.constant 0 : i32
    %c0_i32_0 = arith.constant 0 : i32
    return %arg0, %c0_i32 : i32, i32
  }
  func.func @transform_1(%arg0: i32) -> (i32, i32) {
    %c0_i32 = arith.constant 0 : i32
    %c0_i32_0 = arith.constant 0 : i32
    %c0_i32_1 = arith.constant 0 : i32
    return %c0_i32, %c0_i32_0 : i32, i32
  }
  func.func @transform_2(%arg0: i32) -> (i32, i32) {
    %c0_i32 = arith.constant 0 : i32
    %c0_i32_0 = arith.constant 0 : i32
    %c0_i32_1 = arith.constant 0 : i32
    return %c0_i32, %c0_i32_0 : i32, i32
  }
  func.func @transform_3(%arg0: i32) -> (i32, i32) {
    %c0_i32 = arith.constant 0 : i32
    %c0_i32_0 = arith.constant 0 : i32
    %c0_i32_1 = arith.constant 0 : i32
    return %c0_i32, %c0_i32_0 : i32, i32
  }
  func.func @transform_4(%arg0: i32) -> (i32, i32) {
    %c0_i32 = arith.constant 0 : i32
    %c0_i32_0 = arith.constant 0 : i32
    return %arg0, %c0_i32 : i32, i32
  }
}

module attributes {stable_mosaic.version = 11 : i64} {
  func.func @_transform_kernel(%arg0: i32, %arg1: memref<256x128xbf16, #tpu.memory_space<vmem>>, %arg2: memref<128x128xbf16, #tpu.memory_space<vmem>>, %arg3: memref<256x128xbf16, #tpu.memory_space<vmem>>) attributes {dimension_semantics = [#tpu.dimension_semantics<parallel>], iteration_bounds = array<i64: 1>, scalar_prefetch = 0 : i64, scratch_operands = 0 : i64, tpu.core_type = #tpu.core_type<tc>, window_params = [{transform_indices = @transform_0, window_bounds = array<i64: 256, 128>}, {pipeline_mode = #tpu.pipeline_mode<synchronous>, transform_indices = @transform_1, window_bounds = array<i64: 128, 128>}, {transform_indices = @transform_2, window_bounds = array<i64: 256, 128>}]} {
    %c0 = arith.constant 0 : index
    %c0_0 = arith.constant 0 : index
    %0 = vector.load %arg1[%c0, %c0_0] : memref<256x128xbf16, #tpu.memory_space<vmem>>, vector<256x128xbf16>
    %c0_1 = arith.constant 0 : index
    %c0_2 = arith.constant 0 : index
    %1 = vector.load %arg2[%c0_1, %c0_2] : memref<128x128xbf16, #tpu.memory_space<vmem>>, vector<128x128xbf16>
    %cst = arith.constant dense<0.000000e+00> : vector<256x128xf32>
    %2 = tpu.matmul %0, %1, %cst {dimension_numbers = #tpu.dot_dimension_numbers<[1], [0], [0], [1], [0, 0, 1, 1], [], []>} : vector<256x128xbf16>, vector<128x128xbf16>, vector<256x128xf32> -> vector<256x128xf32>
    %3 = arith.truncf %2 : vector<256x128xf32> to vector<256x128xbf16>
    %c0_3 = arith.constant 0 : index
    %c0_4 = arith.constant 0 : index
    %4 = vector.load %arg3[%c0_3, %c0_4] : memref<256x128xbf16, #tpu.memory_space<vmem>>, vector<256x128xbf16>
    tpu.vector_store %arg3[%c0_3, %c0_4], %3 {strides = array<i32>} : memref<256x128xbf16, #tpu.memory_space<vmem>>, vector<256x128xbf16>,
    return
  }
  func.func @transform_0(%arg0: i32) -> (i32, i32) {
    %c0_i32 = arith.constant 0 : i32
    %c0_i32_0 = arith.constant 0 : i32
    return %arg0, %c0_i32 : i32, i32
  }
  func.func @transform_1(%arg0: i32) -> (i32, i32) {
    %c0_i32 = arith.constant 0 : i32
    %c0_i32_0 = arith.constant 0 : i32
    %c0_i32_1 = arith.constant 0 : i32
    return %c0_i32, %c0_i32_0 : i32, i32
  }
  func.func @transform_2(%arg0: i32) -> (i32, i32) {
    %c0_i32 = arith.constant 0 : i32
    %c0_i32_0 = arith.constant 0 : i32
    return %arg0, %c0_i32 : i32, i32
  }
}

module attributes {stable_mosaic.version = 11 : i64} {
  func.func @_aggregate_kernel(%arg0: i32, %arg1: memref<256x256xbf16, #tpu.memory_space<vmem>>, %arg2: memref<256x128xbf16, #tpu.memory_space<vmem>>, %arg3: memref<1x128xf32, #tpu.memory_space<vmem>>, %arg4: memref<256x128xf32, #tpu.memory_space<vmem>>) attributes {dimension_semantics = [#tpu.dimension_semantics<parallel>], iteration_bounds = array<i64: 1>, scalar_prefetch = 0 : i64, scratch_operands = 0 : i64, tpu.core_type = #tpu.core_type<tc>, window_params = [{transform_indices = @transform_0, window_bounds = array<i64: 256, 256>}, {pipeline_mode = #tpu.pipeline_mode<synchronous>, transform_indices = @transform_1, window_bounds = array<i64: 256, 128>}, {pipeline_mode = #tpu.pipeline_mode<synchronous>, transform_indices = @transform_2, window_bounds = array<i64: 1, 128>}, {transform_indices = @transform_3, window_bounds = array<i64: 256, 128>}]} {
    %c0 = arith.constant 0 : index
    %c0_0 = arith.constant 0 : index
    %0 = vector.load %arg1[%c0, %c0_0] : memref<256x256xbf16, #tpu.memory_space<vmem>>, vector<256x256xbf16>
    %c0_1 = arith.constant 0 : index
    %c0_2 = arith.constant 0 : index
    %1 = vector.load %arg2[%c0_1, %c0_2] : memref<256x128xbf16, #tpu.memory_space<vmem>>, vector<256x128xbf16>
    %cst = arith.constant dense<0.000000e+00> : vector<256x128xf32>
    %2 = tpu.matmul %0, %1, %cst {dimension_numbers = #tpu.dot_dimension_numbers<[1], [0], [0], [1], [0, 0, 1, 1], [], []>} : vector<256x256xbf16>, vector<256x128xbf16>, vector<256x128xf32> -> vector<256x128xf32>
    %c0_3 = arith.constant 0 : index
    %c0_4 = arith.constant 0 : index
    %3 = vector.load %arg3[%c0_3, %c0_4] : memref<1x128xf32, #tpu.memory_space<vmem>>, vector<1x128xf32>
    %4 = vector.broadcast %3 : vector<1x128xf32> to vector<256x128xf32>
    %5 = arith.addf %2, %4 : vector<256x128xf32>
    %c0_5 = arith.constant 0 : index
    %c0_6 = arith.constant 0 : index
    %6 = vector.load %arg4[%c0_5, %c0_6] : memref<256x128xf32, #tpu.memory_space<vmem>>, vector<256x128xf32>
    tpu.vector_store %arg4[%c0_5, %c0_6], %5 {strides = array<i32>} : memref<256x128xf32, #tpu.memory_space<vmem>>, vector<256x128xf32>,
    return
  }
  func.func @transform_0(%arg0: i32) -> (i32, i32) {
    %c0_i32 = arith.constant 0 : i32
    %c0_i32_0 = arith.constant 0 : i32
    return %arg0, %c0_i32 : i32, i32
  }
  func.func @transform_1(%arg0: i32) -> (i32, i32) {
    %c0_i32 = arith.constant 0 : i32
    %c0_i32_0 = arith.constant 0 : i32
    %c0_i32_1 = arith.constant 0 : i32
    return %c0_i32, %c0_i32_0 : i32, i32
  }
  func.func @transform_2(%arg0: i32) -> (i32, i32) {
    %c0_i32 = arith.constant 0 : i32
    %c0_i32_0 = arith.constant 0 : i32
    %c0_i32_1 = arith.constant 0 : i32
    return %c0_i32, %c0_i32_0 : i32, i32
  }
  func.func @transform_3(%arg0: i32) -> (i32, i32) {
    %c0_i32 = arith.constant 0 : i32
    %c0_i32_0 = arith.constant 0 : i32
    return %arg0, %c0_i32 : i32, i32
  }
}

</mosaic_0001>

<bundles_post_ra>
// kernel: gcn_forward.3
= control target key start
LH: loop header
LB: loop body
LE: loop exit
PB: predicated region body
PF: predicated region fallthrough
CT: control target
= control target key end

     0   :  { %s734_s1 = inlined_call_operand.vmem [shape: bf16[128,128], index: 1, kind: input, shape index: {}]   ;;  %s735_s0 = inlined_call_operand.vmem [shape: bf16[256,128], index: 0, kind: input, shape index: {}]   ;;  %s736_s2 = inlined_call_operand.vmem [shape: bf16[256,128], index: 2, kind: output, shape index: {}]  }
   0x1   :  { %v479_v0 = vld [vmem:[%s734_s1 + $0x38] sm:$0xff]  ;;  %v478_v1 = vld [vmem:[%s734_s1 + $0x30] sm:$0xff]  ;;  %v477_v2 = vld [vmem:[%s734_s1 + $0x28] sm:$0xff] }
   0x2   :  { %203 = vmatpush.bf16.msra.mxu0 %v479_v0  ;;  %575 = vmatpush.bf16.msra.mxu1 %v479_v0  ;;  %v476_v3 = vld [vmem:[%s734_s1 + $0x20] sm:$0xff]  ;;  %v475_v4 = vld [vmem:[%s734_s1 + $0x18] sm:$0xff]  ;;  %v474_v5 = vld [vmem:[%s734_s1 + $0x10] sm:$0xff] }
   0x3   :  { %576 = vmatpush.bf16.msra.mxu2 %v479_v0  ;;  %577 = vmatpush.bf16.msra.mxu3 %v479_v0  ;;  %v473_v6 = vld [vmem:[%s734_s1 + $0x8] sm:$0xff]  ;;  %v472_v7 = vld [vmem:[%s734_s1] sm:$0xff]  ;;  %v458_v16 = vld [vmem:[%s735_s0 + $0x10] sm:$0xff] }
   0x4   :  { %v456_v8 = vld [vmem:[%s735_s0] sm:$0xff]  ;;  %v457_v12 = vld [vmem:[%s735_s0 + $0x8] sm:$0xff]  ;;  %v462_v17 = vld [vmem:[%s735_s0 + $0x30] sm:$0xff] }
   0x5   :  { %v460_v9 = vld [vmem:[%s735_s0 + $0x20] sm:$0xff]  ;;  %v461_v13 = vld [vmem:[%s735_s0 + $0x28] sm:$0xff]  ;;  %v466_v18 = vld [vmem:[%s735_s0 + $0x50] sm:$0xff] }
   0x6   :  { %204 = vmatpush.bf16.msra.mxu0 %v478_v1  ;;  %578 = vmatpush.bf16.msra.mxu1 %v478_v1  ;;  %v464_v10 = vld [vmem:[%s735_s0 + $0x40] sm:$0xff]  ;;  %v465_v14 = vld [vmem:[%s735_s0 + $0x48] sm:$0xff]  ;;  %v470_v19 = vld [vmem:[%s735_s0 + $0x70] sm:$0xff] }
   0x7   :  { %579 = vmatpush.bf16.msra.mxu2 %v478_v1  ;;  %580 = vmatpush.bf16.msra.mxu3 %v478_v1  ;;  %v468_v11 = vld [vmem:[%s735_s0 + $0x60] sm:$0xff]  ;;  %v469_v15 = vld [vmem:[%s735_s0 + $0x68] sm:$0xff]  ;;  %v459_v20 = vld [vmem:[%s735_s0 + $0x18] sm:$0xff] }
   0x8   :  { %v463_v21 = vld [vmem:[%s735_s0 + $0x38] sm:$0xff] }
   0x9   :  { %v467_v22 = vld [vmem:[%s735_s0 + $0x58] sm:$0xff] }
   0xa   :  { %205 = vmatpush.bf16.msra.mxu0 %v477_v2  ;;  %581 = vmatpush.bf16.msra.mxu1 %v477_v2  ;;  %v471_v23 = vld [vmem:[%s735_s0 + $0x78] sm:$0xff] }
   0xb   :  { %582 = vmatpush.bf16.msra.mxu2 %v477_v2  ;;  %583 = vmatpush.bf16.msra.mxu3 %v477_v2 }
   0xe   :  { %206 = vmatpush.bf16.msra.mxu0 %v476_v3  ;;  %584 = vmatpush.bf16.msra.mxu1 %v476_v3 }
   0xf   :  { %585 = vmatpush.bf16.msra.mxu2 %v476_v3  ;;  %586 = vmatpush.bf16.msra.mxu3 %v476_v3 }
  0x12   :  { %207 = vmatpush.bf16.msra.mxu0 %v475_v4  ;;  %587 = vmatpush.bf16.msra.mxu1 %v475_v4 }
  0x13   :  { %588 = vmatpush.bf16.msra.mxu2 %v475_v4  ;;  %589 = vmatpush.bf16.msra.mxu3 %v475_v4 }
  0x16   :  { %208 = vmatpush.bf16.msra.mxu0 %v474_v5  ;;  %590 = vmatpush.bf16.msra.mxu1 %v474_v5 }
  0x17   :  { %591 = vmatpush.bf16.msra.mxu2 %v474_v5  ;;  %592 = vmatpush.bf16.msra.mxu3 %v474_v5 }
  0x1a   :  { %209 = vmatpush.bf16.msra.mxu0 %v473_v6  ;;  %593 = vmatpush.bf16.msra.mxu1 %v473_v6 }
  0x1b   :  { %594 = vmatpush.bf16.msra.mxu2 %v473_v6  ;;  %595 = vmatpush.bf16.msra.mxu3 %v473_v6 }
  0x1e   :  { %210 = vmatpush.bf16.msra.mxu0 %v472_v7  ;;  %596 = vmatpush.bf16.msra.mxu1 %v472_v7 }
  0x1f   :  { %597 = vmatpush.bf16.msra.mxu2 %v472_v7  ;;  %598 = vmatpush.bf16.msra.mxu3 %v472_v7 }
  0x21   :  { %211 = vmatmul.bf16.vlgmr.msra.gmra.mxu0 %v456_v8  ;;  %231 = vmatmul.bf16.vlgmr.msra.gmra.mxu1 %v460_v9 }
  0x22   :  { %251 = vmatmul.bf16.vlgmr.msra.gmra.mxu2 %v464_v10  ;;  %271 = vmatmul.bf16.vlgmr.msra.gmra.mxu3 %v468_v11 }
  0x31   :  { %216 = vmatmul.bf16.gmra.mxu0 %v457_v12  ;;  %236 = vmatmul.bf16.gmra.mxu1 %v461_v13 }
  0x32   :  { %256 = vmatmul.bf16.gmra.mxu2 %v465_v14  ;;  %276 = vmatmul.bf16.gmra.mxu3 %v469_v15 }
  0x41   :  { %221 = vmatmul.bf16.gmra.mxu0 %v458_v16  ;;  %241 = vmatmul.bf16.gmra.mxu1 %v462_v17 }
  0x42   :  { %261 = vmatmul.bf16.gmra.mxu2 %v466_v18  ;;  %281 = vmatmul.bf16.gmra.mxu3 %v470_v19 }
  0x51   :  { %226 = vmatmul.bf16.gmra.mxu0 %v459_v20  ;;  %246 = vmatmul.bf16.gmra.mxu1 %v463_v21 }
  0x52   :  { %266 = vmatmul.bf16.gmra.mxu2 %v467_v22  ;;  %286 = vmatmul.bf16.gmra.mxu3 %v471_v23 }
  0x9e   :  { %v212_v24 = vpop.f32.mrf.mxu0  ;;  %v232_v25 = vpop.f32.mrf.mxu1 }
  0xa5   :  { %v252_v26 = vpop.f32.mrf.mxu2  ;;  %v272_v27 = vpop.f32.mrf.mxu3 }
  0xa6   :  { %v214_v28 = vpop.f32.mrf.mxu0  ;;  %v234_v29 = vpop.f32.mrf.mxu1 }
  0xa7   :  { %v483_v30 = vpack.c.bf16 %v214_v28, %v212_v24  ;;  %v503_v31 = vpack.c.bf16 %v234_v29, %v232_v25 }
  0xa9   :  { %484 = vst [vmem:[%s736_s2] sm:$0xff] %v483_v30  }
  0xaa   :  { %563 = vst [vmem:[%s736_s2 + $0x20] sm:$0xff] %v503_v31  }
  0xad   :  { %v254_v32 = vpop.f32.mrf.mxu2  ;;  %v274_v33 = vpop.f32.mrf.mxu3 }
  0xae   :  { %v523_v34 = vpack.c.bf16 %v254_v32, %v252_v26  ;;  %v543_v35 = vpack.c.bf16 %v274_v33, %v272_v27  ;;  %v217_v36 = vpop.f32.mrf.mxu0  ;;  %v237_v37 = vpop.f32.mrf.mxu1 }
  0xb0   :  { %567 = vst [vmem:[%s736_s2 + $0x40] sm:$0xff] %v523_v34  }
  0xb1   :  { %571 = vst [vmem:[%s736_s2 + $0x60] sm:$0xff] %v543_v35  }
  0xb5   :  { %v257_v38 = vpop.f32.mrf.mxu2  ;;  %v277_v39 = vpop.f32.mrf.mxu3 }
  0xb6   :  { %v219_v40 = vpop.f32.mrf.mxu0  ;;  %v239_v41 = vpop.f32.mrf.mxu1 }
  0xb7   :  { %v488_v42 = vpack.c.bf16 %v219_v40, %v217_v36  ;;  %v508_v43 = vpack.c.bf16 %v239_v41, %v237_v37 }
  0xb9   :  { %560 = vst [vmem:[%s736_s2 + $0x8] sm:$0xff] %v488_v42  }
  0xba   :  { %564 = vst [vmem:[%s736_s2 + $0x28] sm:$0xff] %v508_v43  }
  0xbd   :  { %v259_v44 = vpop.f32.mrf.mxu2  ;;  %v279_v45 = vpop.f32.mrf.mxu3 }
  0xbe   :  { %v528_v46 = vpack.c.bf16 %v259_v44, %v257_v38  ;;  %v548_v47 = vpack.c.bf16 %v279_v45, %v277_v39  ;;  %v222_v48 = vpop.f32.mrf.mxu0  ;;  %v242_v49 = vpop.f32.mrf.mxu1 }
  0xc0   :  { %568 = vst [vmem:[%s736_s2 + $0x48] sm:$0xff] %v528_v46  }
  0xc1   :  { %572 = vst [vmem:[%s736_s2 + $0x68] sm:$0xff] %v548_v47  }
  0xc5   :  { %v262_v50 = vpop.f32.mrf.mxu2  ;;  %v282_v51 = vpop.f32.mrf.mxu3 }
  0xc6   :  { %v224_v52 = vpop.f32.mrf.mxu0  ;;  %v244_v53 = vpop.f32.mrf.mxu1 }
  0xc7   :  { %v493_v54 = vpack.c.bf16 %v224_v52, %v222_v48  ;;  %v513_v55 = vpack.c.bf16 %v244_v53, %v242_v49 }
  0xc9   :  { %561 = vst [vmem:[%s736_s2 + $0x10] sm:$0xff] %v493_v54  }
  0xca   :  { %565 = vst [vmem:[%s736_s2 + $0x30] sm:$0xff] %v513_v55  }
  0xcd   :  { %v264_v56 = vpop.f32.mrf.mxu2  ;;  %v284_v57 = vpop.f32.mrf.mxu3 }
  0xce   :  { %v533_v58 = vpack.c.bf16 %v264_v56, %v262_v50  ;;  %v553_v59 = vpack.c.bf16 %v284_v57, %v282_v51  ;;  %v227_v60 = vpop.f32.mrf.mxu0  ;;  %v247_v61 = vpop.f32.mrf.mxu1 }
  0xd0   :  { %569 = vst [vmem:[%s736_s2 + $0x50] sm:$0xff] %v533_v58  }
  0xd1   :  { %573 = vst [vmem:[%s736_s2 + $0x70] sm:$0xff] %v553_v59  }
  0xd5   :  { %v267_v62 = vpop.f32.mrf.mxu2  ;;  %v287_v63 = vpop.f32.mrf.mxu3 }
  0xd6   :  { %v229_v0 = vpop.f32.mrf.mxu0  ;;  %v249_v1 = vpop.f32.mrf.mxu1 }
  0xd7   :  { %v498_v2 = vpack.c.bf16 %v229_v0, %v227_v60  ;;  %v518_v3 = vpack.c.bf16 %v249_v1, %v247_v61 }
  0xd9   :  { %562 = vst [vmem:[%s736_s2 + $0x18] sm:$0xff] %v498_v2  }
  0xda   :  { %566 = vst [vmem:[%s736_s2 + $0x38] sm:$0xff] %v518_v3  }
  0xdd   :  { %v269_v4 = vpop.f32.mrf.mxu2  ;;  %v289_v5 = vpop.f32.mrf.mxu3 }
  0xde   :  { %v538_v6 = vpack.c.bf16 %v269_v4, %v267_v62  ;;  %v558_v7 = vpack.c.bf16 %v289_v5, %v287_v63 }
  0xe0   :  { %570 = vst [vmem:[%s736_s2 + $0x58] sm:$0xff] %v538_v6  }
  0xe1   :  { %574 = vst [vmem:[%s736_s2 + $0x78] sm:$0xff] %v558_v7  }

// kernel: gcn_forward.4
= control target key start
LH: loop header
LB: loop body
LE: loop exit
PB: predicated region body
PF: predicated region fallthrough
CT: control target
= control target key end

     0   :  { %s1586_s1 = inlined_call_operand.vmem [shape: bf16[256,128], index: 1, kind: input, shape index: {}]   ;;  %s1587_s2 = inlined_call_operand.vmem [shape: f32[1,128], index: 2, kind: input, shape index: {}]   ;;  %s1588_s0 = inlined_call_operand.vmem [shape: bf16[256,256], index: 0, kind: input, shape index: {}]   ;;  %s1589_s3 = inlined_call_operand.vmem [shape: bf16[128,128], index: 3, kind: input, shape index: {}]   ;;  %s1590_s4 = inlined_call_operand.vmem [shape: bf16[256,128], index: 4, kind: output, shape index: {}]  }
   0x1   :  { %v1051_v0 = vld [vmem:[%s1586_s1 + $0x38] sm:$0xff]  ;;  %v1050_v2 = vld [vmem:[%s1586_s1 + $0x30] sm:$0xff]  ;;  %v1049_v4 = vld [vmem:[%s1586_s1 + $0x28] sm:$0xff] }
   0x2   :  { %v1059_v1 = vld [vmem:[%s1586_s1 + $0x78] sm:$0xff]  ;;  %341 = vmatpush.bf16.msra.mxu0 %v1051_v0  ;;  %1163 = vmatpush.bf16.msra.mxu3 %v1051_v0  ;;  %v1058_v3 = vld [vmem:[%s1586_s1 + $0x70] sm:$0xff]  ;;  %v1057_v5 = vld [vmem:[%s1586_s1 + $0x68] sm:$0xff] }
   0x3   :  { %430 = vmatpush.bf16.msra.mxu1 %v1059_v1  ;;  %v1048_v6 = vld [vmem:[%s1586_s1 + $0x20] sm:$0xff]  ;;  %v1047_v8 = vld [vmem:[%s1586_s1 + $0x18] sm:$0xff]  ;;  %v1046_v10 = vld [vmem:[%s1586_s1 + $0x10] sm:$0xff] }
   0x4   :  { %v1056_v7 = vld [vmem:[%s1586_s1 + $0x60] sm:$0xff]  ;;  %v1055_v9 = vld [vmem:[%s1586_s1 + $0x58] sm:$0xff]  ;;  %v1054_v11 = vld [vmem:[%s1586_s1 + $0x50] sm:$0xff] }
   0x5   :  { %v1045_v12 = vld [vmem:[%s1586_s1 + $0x8] sm:$0xff]  ;;  %v1044_v14 = vld [vmem:[%s1586_s1] sm:$0xff]  ;;  %v798_v25 = vld [vmem:[%s1588_s0 + $0x10] sm:$0xf] }
   0x6   :  { %342 = vmatpush.bf16.msra.mxu0 %v1050_v2  ;;  %1164 = vmatpush.bf16.msra.mxu3 %v1050_v2  ;;  %v1053_v13 = vld [vmem:[%s1586_s1 + $0x48] sm:$0xff]  ;;  %v790_v15 = vld [vmem:[%s1588_s0] sm:$0xf]  ;;  %v1012_v20 = vld [vmem:[%s1588_s0 + $0x4] sm:$0xf] }
   0x7   :  { %431 = vmatpush.bf16.msra.mxu1 %v1058_v3  ;;  %v1013_v16 = vld [vmem:[%s1588_s0 + $0x4] sm:$0xf0]  ;;  %v886_v17 = vld [vmem:[%s1588_s0 + $0xc0] sm:$0xf]  ;;  %v792_v21 = vld [vmem:[%s1588_s0 + $0x8] sm:$0xf0] }
   0x8   :  { %v1037_v18 = vld [vmem:[%s1588_s0 + $0xc4] sm:$0xf0]  ;;  %v1052_v19 = vld [vmem:[%s1586_s1 + $0x40] sm:$0xff]  ;;  %v791_v22 = vor.u32 %v1013_v16, %v790_v15  ;;  %v795_v24 = vor.u32 %v1012_v20, %v792_v21  ;;  %v1015_v26 = vld [vmem:[%s1588_s0 + $0x14] sm:$0xf0] }
   0x9   :  { %v887_v23 = vor.u32 %v1037_v18, %v886_v17  ;;  %v894_v27 = vld [vmem:[%s1588_s0 + $0xd0] sm:$0xf]  ;;  %v1039_v28 = vld [vmem:[%s1588_s0 + $0xd4] sm:$0xf0]  ;;  %v1014_v29 = vld [vmem:[%s1588_s0 + $0x14] sm:$0xf]  ;;  %v799_v31 = vor.u32 %v1015_v26, %v798_v25 }
   0xa   :  { %343 = vmatpush.bf16.msra.mxu0 %v1049_v4  ;;  %1165 = vmatpush.bf16.msra.mxu3 %v1049_v4  ;;  %v800_v30 = vld [vmem:[%s1588_s0 + $0x18] sm:$0xf0]  ;;  %v895_v32 = vor.u32 %v1039_v28, %v894_v27  ;;  %v806_v34 = vld [vmem:[%s1588_s0 + $0x20] sm:$0xf]  ;;  %v1017_v35 = vld [vmem:[%s1588_s0 + $0x24] sm:$0xf0] }
   0xb   :  { %432 = vmatpush.bf16.msra.mxu1 %v1057_v5  ;;  %v803_v33 = vor.u32 %v1014_v29, %v800_v30  ;;  %v902_v36 = vld [vmem:[%s1588_s0 + $0xe0] sm:$0xf]  ;;  %v1041_v37 = vld [vmem:[%s1588_s0 + $0xe4] sm:$0xf0]  ;;  %v1016_v38 = vld [vmem:[%s1588_s0 + $0x24] sm:$0xf]  ;;  %v807_v40 = vor.u32 %v1017_v35, %v806_v34 }
   0xc   :  { %v808_v39 = vld [vmem:[%s1588_s0 + $0x28] sm:$0xf0]  ;;  %v903_v41 = vor.u32 %v1041_v37, %v902_v36  ;;  %v814_v43 = vld [vmem:[%s1588_s0 + $0x30] sm:$0xf]  ;;  %v1019_v44 = vld [vmem:[%s1588_s0 + $0x34] sm:$0xf0] }
   0xd   :  { %v811_v42 = vor.u32 %v1016_v38, %v808_v39  ;;  %v910_v45 = vld [vmem:[%s1588_s0 + $0xf0] sm:$0xf]  ;;  %v1043_v46 = vld [vmem:[%s1588_s0 + $0xf4] sm:$0xf0]  ;;  %v1018_v47 = vld [vmem:[%s1588_s0 + $0x34] sm:$0xf]  ;;  %v815_v49 = vor.u32 %v1019_v44, %v814_v43 }
   0xe   :  { %344 = vmatpush.bf16.msra.mxu0 %v1048_v6  ;;  %1166 = vmatpush.bf16.msra.mxu3 %v1048_v6  ;;  %v816_v48 = vld [vmem:[%s1588_s0 + $0x38] sm:$0xf0]  ;;  %v911_v50 = vor.u32 %v1043_v46, %v910_v45  ;;  %v822_v52 = vld [vmem:[%s1588_s0 + $0x40] sm:$0xf]  ;;  %v1021_v53 = vld [vmem:[%s1588_s0 + $0x44] sm:$0xf0] }
   0xf   :  { %433 = vmatpush.bf16.msra.mxu1 %v1056_v7  ;;  %v819_v51 = vor.u32 %v1018_v47, %v816_v48  ;;  %v1036_v54 = vld [vmem:[%s1588_s0 + $0xc4] sm:$0xf]  ;;  %v888_v55 = vld [vmem:[%s1588_s0 + $0xc8] sm:$0xf0]  ;;  %v823_v58 = vor.u32 %v1021_v53, %v822_v52  ;;  %v1067_v61 = vld [vmem:[%s1589_s3 + $0x38] sm:$0xff] }
  0x10   :  { %v1020_v56 = vld [vmem:[%s1588_s0 + $0x44] sm:$0xf]  ;;  %v824_v57 = vld [vmem:[%s1588_s0 + $0x48] sm:$0xf0]  ;;  %v891_v59 = vor.u32 %v1036_v54, %v888_v55  ;;  %631 = vmatpush.bf16.msra.mxu2 %v1067_v61  ;;  %v830_v62 = vld [vmem:[%s1588_s0 + $0x50] sm:$0xf] }
  0x11   :  { %v827_v60 = vor.u32 %v1020_v56, %v824_v57  ;;  %v1023_v63 = vld [vmem:[%s1588_s0 + $0x54] sm:$0xf0]  ;;  %v1038_v0 = vld [vmem:[%s1588_s0 + $0xd4] sm:$0xf]  ;;  %v840_v15 = vld [vmem:[%s1588_s0 + $0x68] sm:$0xf0] }
  0x12   :  { %345 = vmatpush.bf16.msra.mxu0 %v1047_v8  ;;  %1167 = vmatpush.bf16.msra.mxu3 %v1047_v8  ;;  %v1022_v2 = vld [vmem:[%s1588_s0 + $0x54] sm:$0xf]  ;;  %v831_v4 = vor.u32 %v1023_v63, %v830_v62  ;;  %v1065_v8 = vld [vmem:[%s1589_s3 + $0x28] sm:$0xff]  ;;  %v912_v25 = vld [vmem:[%s1588_s0 + $0xf8] sm:$0xf0] }
  0x13   :  { %434 = vmatpush.bf16.msra.mxu1 %v1055_v9  ;;  %v1062_v20 = vld [vmem:[%s1589_s3 + $0x10] sm:$0xff]  ;;  %v1061_v21 = vld [vmem:[%s1589_s3 + $0x8] sm:$0xff]  ;;  %v848_v27 = vld [vmem:[%s1588_s0 + $0x78] sm:$0xf0] }
  0x14   :  { %v1026_v26 = vld [vmem:[%s1588_s0 + $0x74] sm:$0xf]  ;;  %v1060_v28 = vld [vmem:[%s1589_s3] sm:$0xff]  ;;  %v856_v35 = vld [vmem:[%s1588_s0 + $0x88] sm:$0xf0] }
  0x15   :  { %v1028_v34 = vld [vmem:[%s1588_s0 + $0x84] sm:$0xf]  ;;  %v1444_v39 = vld [vmem:[%s1587_s2] ss:$0 sm:$0xff]  ;;  %v862_v48 = vld [vmem:[%s1588_s0 + $0x90] sm:$0xf] }
  0x16   :  { %346 = vmatpush.bf16.msra.mxu0 %v1046_v10  ;;  %1168 = vmatpush.bf16.msra.mxu3 %v1046_v10  ;;  %v838_v10 = vld [vmem:[%s1588_s0 + $0x60] sm:$0xf]  ;;  %v859_v38 = vor.u32 %v1028_v34, %v856_v35  ;;  %v1030_v52 = vld [vmem:[%s1588_s0 + $0x94] sm:$0xf]  ;;  %v864_v53 = vld [vmem:[%s1588_s0 + $0x98] sm:$0xf0] }
  0x17   :  { %435 = vmatpush.bf16.msra.mxu1 %v1054_v11 }
  0x1a   :  { %347 = vmatpush.bf16.msra.mxu0 %v1045_v12  ;;  %1169 = vmatpush.bf16.msra.mxu3 %v1045_v12  ;;  %v1040_v12 = vld [vmem:[%s1588_s0 + $0xe4] sm:$0xf] }
  0x1b   :  { %436 = vmatpush.bf16.msra.mxu1 %v1053_v13 }
  0x1e   :  { %348 = vmatpush.bf16.msra.mxu0 %v1044_v14  ;;  %1170 = vmatpush.bf16.msra.mxu3 %v1044_v14  ;;  %v1024_v14 = vld [vmem:[%s1588_s0 + $0x64] sm:$0xf] }
  0x1f   :  { %437 = vmatpush.bf16.msra.mxu1 %v1052_v19  ;;  %v843_v18 = vor.u32 %v1024_v14, %v840_v15 }
  0x21   :  { %349 = vmatmul.bf16.vlgmr.msra.gmra.mxu0 %v791_v22  ;;  %409 = vmatmul.bf16.vlgmr.msra.gmra.mxu3 %v887_v23  ;;  %v846_v22 = vld [vmem:[%s1588_s0 + $0x70] sm:$0xf]  ;;  %v1027_v23 = vld [vmem:[%s1588_s0 + $0x74] sm:$0xf0] }
  0x22   :  { %1171 = vmatpush.bf16.msrb.mxu3 %v1059_v1  ;;  %438 = vmatmul.bf16.vlgmr.msra.gmra.mxu1 %v795_v24  ;;  %v896_v1 = vld [vmem:[%s1588_s0 + $0xd8] sm:$0xf0]  ;;  %v1042_v24 = vld [vmem:[%s1588_s0 + $0xf4] sm:$0xf]  ;;  %v847_v29 = vor.u32 %v1027_v23, %v846_v22  ;;  %v878_v22 = vld [vmem:[%s1588_s0 + $0xb0] sm:$0xf] }
  0x23   :  { %v915_v30 = vor.u32 %v1042_v24, %v912_v25  ;;  %v1035_v23 = vld [vmem:[%s1588_s0 + $0xb4] sm:$0xf0] }
  0x26   :  { %1172 = vmatpush.bf16.msrb.mxu3 %v1058_v3  ;;  %v832_v3 = vld [vmem:[%s1588_s0 + $0x58] sm:$0xf0] }
  0x27   :  { %v835_v6 = vor.u32 %v1022_v2, %v832_v3  ;;  %v870_v3 = vld [vmem:[%s1588_s0 + $0xa0] sm:$0xf] }
  0x2a   :  { %1173 = vmatpush.bf16.msrb.mxu3 %v1057_v5  ;;  %v899_v5 = vor.u32 %v1038_v0, %v896_v1 }
  0x2e   :  { %1174 = vmatpush.bf16.msrb.mxu3 %v1056_v7  ;;  %v1066_v7 = vld [vmem:[%s1589_s3 + $0x30] sm:$0xff] }
  0x2f   :  { %632 = vmatpush.bf16.msra.mxu2 %v1066_v7 }
  0x31   :  { %354 = vmatmul.bf16.gmra.mxu0 %v799_v31  ;;  %414 = vmatmul.bf16.gmra.mxu3 %v895_v32  ;;  %v851_v31 = vor.u32 %v1026_v26, %v848_v27  ;;  %v854_v32 = vld [vmem:[%s1588_s0 + $0x80] sm:$0xf]  ;;  %v1034_v26 = vld [vmem:[%s1588_s0 + $0xb4] sm:$0xf]  ;;  %v880_v27 = vld [vmem:[%s1588_s0 + $0xb8] sm:$0xf0] }
  0x32   :  { %1175 = vmatpush.bf16.msrb.mxu3 %v1055_v9  ;;  %443 = vmatmul.bf16.gmra.mxu1 %v803_v33  ;;  %v1064_v9 = vld [vmem:[%s1589_s3 + $0x20] sm:$0xff]  ;;  %v1029_v33 = vld [vmem:[%s1588_s0 + $0x84] sm:$0xf0] }
  0x33   :  { %633 = vmatpush.bf16.msra.mxu2 %v1065_v8  ;;  %v855_v36 = vor.u32 %v1029_v33, %v854_v32  ;;  %v883_v32 = vor.u32 %v1034_v26, %v880_v27 }
  0x36   :  { %1176 = vmatpush.bf16.msrb.mxu3 %v1054_v11  ;;  %v1025_v11 = vld [vmem:[%s1588_s0 + $0x64] sm:$0xf0] }
  0x37   :  { %634 = vmatpush.bf16.msra.mxu2 %v1064_v9  ;;  %v839_v16 = vor.u32 %v1025_v11, %v838_v10 }
  0x3a   :  { %1177 = vmatpush.bf16.msrb.mxu3 %v1053_v13  ;;  %v904_v13 = vld [vmem:[%s1588_s0 + $0xe8] sm:$0xf0] }
  0x3b   :  { %v907_v17 = vor.u32 %v1040_v12, %v904_v13 }
  0x3e   :  { %1178 = vmatpush.bf16.msrb.mxu3 %v1052_v19  ;;  %v1063_v19 = vld [vmem:[%s1589_s3 + $0x18] sm:$0xff] }
  0x3f   :  { %635 = vmatpush.bf16.msra.mxu2 %v1063_v19 }
  0x41   :  { %359 = vmatmul.bf16.gmra.mxu0 %v807_v40  ;;  %419 = vmatmul.bf16.gmra.mxu3 %v903_v41 }
  0x42   :  { %448 = vmatmul.bf16.gmra.mxu1 %v811_v42  ;;  %1179 = vmatpush.bf16.msra.mxu3 %v1067_v61 }
  0x43   :  { %636 = vmatpush.bf16.msra.mxu2 %v1062_v20 }
  0x46   :  { %1180 = vmatpush.bf16.msra.mxu3 %v1066_v7  ;;  %v1032_v7 = vld [vmem:[%s1588_s0 + $0xa4] sm:$0xf] }
  0x47   :  { %637 = vmatpush.bf16.msra.mxu2 %v1061_v21 }
  0x4a   :  { %1181 = vmatpush.bf16.msra.mxu3 %v1065_v8  ;;  %v872_v8 = vld [vmem:[%s1588_s0 + $0xa8] sm:$0xf0] }
  0x4b   :  { %638 = vmatpush.bf16.msra.mxu2 %v1060_v28  ;;  %v875_v13 = vor.u32 %v1032_v7, %v872_v8 }
  0x4e   :  { %1182 = vmatpush.bf16.msra.mxu3 %v1064_v9 }
  0x51   :  { %364 = vmatmul.bf16.gmra.mxu0 %v815_v49  ;;  %424 = vmatmul.bf16.gmra.mxu3 %v911_v50  ;;  %v1031_v49 = vld [vmem:[%s1588_s0 + $0x94] sm:$0xf0] }
  0x52   :  { %453 = vmatmul.bf16.gmra.mxu1 %v819_v51  ;;  %1183 = vmatpush.bf16.msra.mxu3 %v1063_v19  ;;  %v863_v56 = vor.u32 %v1031_v49, %v862_v48 }
  0x56   :  { %1184 = vmatpush.bf16.msra.mxu3 %v1062_v20 }
  0x5a   :  { %1185 = vmatpush.bf16.msra.mxu3 %v1061_v21 }
  0x5e   :  { %1186 = vmatpush.bf16.msra.mxu3 %v1060_v28 }
  0x61   :  { %369 = vmatmul.bf16.gmra.mxu0 %v823_v58  ;;  %498 = vmatmul.bf16.vlgmr.msrb.gmra.mxu3 %v891_v59  ;;  %v867_v58 = vor.u32 %v1030_v52, %v864_v53 }
  0x62   :  { %458 = vmatmul.bf16.gmra.mxu1 %v827_v60 }
  0x71   :  { %374 = vmatmul.bf16.gmra.mxu0 %v831_v4  ;;  %503 = vmatmul.bf16.gmra.mxu3 %v899_v5  ;;  %v1033_v4 = vld [vmem:[%s1588_s0 + $0xa4] sm:$0xf0] }
  0x72   :  { %463 = vmatmul.bf16.gmra.mxu1 %v835_v6  ;;  %v871_v11 = vor.u32 %v1033_v4, %v870_v3 }
  0x81   :  { %379 = vmatmul.bf16.gmra.mxu0 %v839_v16  ;;  %508 = vmatmul.bf16.gmra.mxu3 %v907_v17 }
  0x82   :  { %468 = vmatmul.bf16.gmra.mxu1 %v843_v18 }
  0x91   :  { %384 = vmatmul.bf16.gmra.mxu0 %v847_v29  ;;  %513 = vmatmul.bf16.gmra.mxu3 %v915_v30  ;;  %v879_v30 = vor.u32 %v1035_v23, %v878_v22 }
  0x92   :  { %473 = vmatmul.bf16.gmra.mxu1 %v851_v31 }
  0x9e   :  { %v350_v37 = vpop.f32.mrf.mxu0 }
  0x9f   :  { %v439_v40 = vpop.f32.mrf.mxu1  ;;  %v351_v41 = vadd.f32 %v1444_v39, %v350_v37 }
  0xa1   :  { %389 = vmatmul.bf16.gmra.mxu0 %v855_v36  ;;  %v440_v44 = vadd.f32 %v439_v40, %v351_v41 }
  0xa2   :  { %478 = vmatmul.bf16.gmra.mxu1 %v859_v38 }
  0xa3   :  { %v519_v50 = vmax.f32 %v440_v44, 0.0 }
  0xa4   :  { %v1447_v42 = vpop.f32.mrf.mxu3 }
  0xa6   :  { %v352_v43 = vpop.f32.mrf.mxu0 }
  0xa7   :  { %v353_v45 = vadd.f32 %v1444_v39, %v352_v43  ;;  %v441_v46 = vpop.f32.mrf.mxu1 }
  0xa9   :  { %v442_v47 = vadd.f32 %v441_v46, %v353_v45 }
  0xab   :  { %v520_v51 = vmax.f32 %v442_v47, 0.0 }
  0xac   :  { %v1462_v54 = vpop.f32.mrf.mxu3 }
  0xad   :  { %v551_v55 = vpack.c.bf16 %v520_v51, %v519_v50 }
  0xae   :  { %v355_v57 = vpop.f32.mrf.mxu0 }
  0xaf   :  { %v444_v59 = vpop.f32.mrf.mxu1  ;;  %639 = vmatmul.bf16.vlgmr.msra.gmra.mxu2 %v551_v55  ;;  %v356_v60 = vadd.f32 %v1444_v39, %v355_v57 }
  0xb1   :  { %394 = vmatmul.bf16.gmra.mxu0 %v863_v56  ;;  %v445_v63 = vadd.f32 %v444_v59, %v356_v60  ;;  %v411_v56 = vadd.f32 %v1444_v39, %v1447_v42 }
  0xb2   :  { %483 = vmatmul.bf16.gmra.mxu1 %v867_v58  ;;  %v413_v58 = vadd.f32 %v1444_v39, %v1462_v54 }
  0xb3   :  { %v521_v5 = vmax.f32 %v445_v63, 0.0 }
  0xb4   :  { %v1465_v61 = vpop.f32.mrf.mxu3 }
  0xb6   :  { %v357_v62 = vpop.f32.mrf.mxu0 }
  0xb7   :  { %v358_v0 = vadd.f32 %v1444_v39, %v357_v62  ;;  %v446_v1 = vpop.f32.mrf.mxu1 }
  0xb9   :  { %v447_v2 = vadd.f32 %v446_v1, %v358_v0 }
  0xbb   :  { %v522_v6 = vmax.f32 %v447_v2, 0.0 }
  0xbc   :  { %v1480_v9 = vpop.f32.mrf.mxu3 }
  0xbd   :  { %v552_v10 = vpack.c.bf16 %v522_v6, %v521_v5 }
  0xbe   :  { %v360_v12 = vpop.f32.mrf.mxu0 }
  0xbf   :  { %v449_v14 = vpop.f32.mrf.mxu1  ;;  %644 = vmatmul.bf16.gmra.mxu2 %v552_v10  ;;  %v361_v15 = vadd.f32 %v1444_v39, %v360_v12  ;;  %v416_v12 = vadd.f32 %v1444_v39, %v1465_v61 }
  0xc1   :  { %399 = vmatmul.bf16.gmra.mxu0 %v871_v11  ;;  %v450_v18 = vadd.f32 %v449_v14, %v361_v15  ;;  %v418_v14 = vadd.f32 %v1444_v39, %v1480_v9 }
  0xc2   :  { %488 = vmatmul.bf16.gmra.mxu1 %v875_v13 }
  0xc3   :  { %v523_v24 = vmax.f32 %v450_v18, 0.0 }
  0xc4   :  { %v1483_v16 = vpop.f32.mrf.mxu3 }
  0xc6   :  { %v362_v17 = vpop.f32.mrf.mxu0 }
  0xc7   :  { %v363_v19 = vadd.f32 %v1444_v39, %v362_v17  ;;  %v451_v20 = vpop.f32.mrf.mxu1 }
  0xc9   :  { %v452_v21 = vadd.f32 %v451_v20, %v363_v19 }
  0xcb   :  { %v524_v25 = vmax.f32 %v452_v21, 0.0 }
  0xcc   :  { %v1498_v28 = vpop.f32.mrf.mxu3 }
  0xcd   :  { %v553_v29 = vpack.c.bf16 %v524_v25, %v523_v24 }
  0xce   :  { %v365_v31 = vpop.f32.mrf.mxu0 }
  0xcf   :  { %v454_v33 = vpop.f32.mrf.mxu1  ;;  %649 = vmatmul.bf16.gmra.mxu2 %v553_v29  ;;  %v366_v34 = vadd.f32 %v1444_v39, %v365_v31 }
  0xd1   :  { %404 = vmatmul.bf16.gmra.mxu0 %v879_v30  ;;  %v455_v37 = vadd.f32 %v454_v33, %v366_v34  ;;  %v423_v34 = vadd.f32 %v1444_v39, %v1498_v28 }
  0xd2   :  { %493 = vmatmul.bf16.gmra.mxu1 %v883_v32  ;;  %v421_v32 = vadd.f32 %v1444_v39, %v1483_v16 }
  0xd3   :  { %v525_v43 = vmax.f32 %v455_v37, 0.0 }
  0xd4   :  { %v1501_v35 = vpop.f32.mrf.mxu3 }
  0xd6   :  { %v367_v36 = vpop.f32.mrf.mxu0 }
  0xd7   :  { %v368_v38 = vadd.f32 %v1444_v39, %v367_v36  ;;  %v456_v40 = vpop.f32.mrf.mxu1 }
  0xd9   :  { %v457_v41 = vadd.f32 %v456_v40, %v368_v38 }
  0xdb   :  { %v526_v44 = vmax.f32 %v457_v41, 0.0 }
  0xdc   :  { %v1504_v45 = vpop.f32.mrf.mxu3 }
  0xdd   :  { %v554_v46 = vpack.c.bf16 %v526_v44, %v525_v43 }
  0xde   :  { %v370_v47 = vpop.f32.mrf.mxu0 }
  0xdf   :  { %v459_v48 = vpop.f32.mrf.mxu1  ;;  %654 = vmatmul.bf16.gmra.mxu2 %v554_v46  ;;  %v371_v49 = vadd.f32 %v1444_v39, %v370_v47 }
  0xe1   :  { %v460_v52 = vadd.f32 %v459_v48, %v371_v49 }
  0xe3   :  { %v527_v59 = vmax.f32 %v460_v52, 0.0 }
  0xe4   :  { %v499_v50 = vpop.f32.mrf.mxu3 }
  0xe5   :  { %v500_v60 = vadd.f32 %v499_v50, %v411_v56 }
  0xe6   :  { %v372_v51 = vpop.f32.mrf.mxu0 }
  0xe7   :  { %v373_v53 = vadd.f32 %v1444_v39, %v372_v51  ;;  %v461_v55 = vpop.f32.mrf.mxu1  ;;  %v543_v3 = vmax.f32 %v500_v60, 0.0 }
  0xe9   :  { %v462_v57 = vadd.f32 %v461_v55, %v373_v53  ;;  %v426_v55 = vadd.f32 %v1444_v39, %v1501_v35 }
  0xeb   :  { %v528_v62 = vmax.f32 %v462_v57, 0.0  ;;  %v428_v57 = vadd.f32 %v1444_v39, %v1504_v45 }
  0xec   :  { %v501_v63 = vpop.f32.mrf.mxu3 }
  0xed   :  { %v502_v0 = vadd.f32 %v501_v63, %v413_v58  ;;  %v555_v1 = vpack.c.bf16 %v528_v62, %v527_v59 }
  0xee   :  { %v375_v2 = vpop.f32.mrf.mxu0 }
  0xef   :  { %v544_v4 = vmax.f32 %v502_v0, 0.0  ;;  %v464_v5 = vpop.f32.mrf.mxu1  ;;  %659 = vmatmul.bf16.gmra.mxu2 %v555_v1  ;;  %v376_v7 = vadd.f32 %v1444_v39, %v375_v2 }
  0xf1   :  { %v563_v6 = vpack.c.bf16 %v544_v4, %v543_v3  ;;  %v465_v10 = vadd.f32 %v464_v5, %v376_v7 }
  0xf3   :  { %699 = vmatmul.bf16.vlgmr.msra.gmra.mxu3 %v563_v6  ;;  %v529_v15 = vmax.f32 %v465_v10, 0.0 }
  0xf4   :  { %v504_v42 = vpop.f32.mrf.mxu3 }
  0xf5   :  { %v505_v17 = vadd.f32 %v504_v42, %v416_v12 }
  0xf6   :  { %v377_v8 = vpop.f32.mrf.mxu0 }
  0xf7   :  { %v378_v54 = vadd.f32 %v1444_v39, %v377_v8  ;;  %v466_v11 = vpop.f32.mrf.mxu1  ;;  %v545_v23 = vmax.f32 %v505_v17, 0.0 }
  0xf9   :  { %v467_v13 = vadd.f32 %v466_v11, %v378_v54 }
  0xfb   :  { %v530_v18 = vmax.f32 %v467_v13, 0.0 }
  0xfc   :  { %v506_v19 = vpop.f32.mrf.mxu3 }
  0xfd   :  { %v507_v20 = vadd.f32 %v506_v19, %v418_v14  ;;  %v556_v21 = vpack.c.bf16 %v530_v18, %v529_v15 }
  0xfe   :  { %v380_v22 = vpop.f32.mrf.mxu0 }
  0xff   :  { %v546_v24 = vmax.f32 %v507_v20, 0.0  ;;  %v469_v25 = vpop.f32.mrf.mxu1  ;;  %664 = vmatmul.bf16.gmra.mxu2 %v556_v21  ;;  %v381_v27 = vadd.f32 %v1444_v39, %v380_v22 }
 0x101   :  { %v564_v26 = vpack.c.bf16 %v546_v24, %v545_v23  ;;  %v470_v30 = vadd.f32 %v469_v25, %v381_v27 }
 0x103   :  { %704 = vmatmul.bf16.gmra.mxu3 %v564_v26  ;;  %v531_v36 = vmax.f32 %v470_v30, 0.0 }
 0x104   :  { %v509_v61 = vpop.f32.mrf.mxu3 }
 0x105   :  { %v510_v37 = vadd.f32 %v509_v61, %v421_v32 }
 0x106   :  { %v382_v29 = vpop.f32.mrf.mxu0 }
 0x107   :  { %v383_v9 = vadd.f32 %v1444_v39, %v382_v29  ;;  %v471_v31 = vpop.f32.mrf.mxu1  ;;  %v547_v46 = vmax.f32 %v510_v37, 0.0 }
 0x109   :  { %v472_v33 = vadd.f32 %v471_v31, %v383_v9 }
 0x10b   :  { %v532_v38 = vmax.f32 %v472_v33, 0.0 }
 0x10c   :  { %v511_v40 = vpop.f32.mrf.mxu3 }
 0x10d   :  { %v512_v41 = vadd.f32 %v511_v40, %v423_v34  ;;  %v557_v43 = vpack.c.bf16 %v532_v38, %v531_v36 }
 0x10e   :  { %v385_v44 = vpop.f32.mrf.mxu0 }
 0x10f   :  { %v548_v47 = vmax.f32 %v512_v41, 0.0  ;;  %v474_v48 = vpop.f32.mrf.mxu1  ;;  %669 = vmatmul.bf16.gmra.mxu2 %v557_v43  ;;  %v386_v50 = vadd.f32 %v1444_v39, %v385_v44 }
 0x111   :  { %v565_v49 = vpack.c.bf16 %v548_v47, %v547_v46  ;;  %v475_v52 = vadd.f32 %v474_v48, %v386_v50 }
 0x113   :  { %709 = vmatmul.bf16.gmra.mxu3 %v565_v49  ;;  %v533_v58 = vmax.f32 %v475_v52, 0.0 }
 0x114   :  { %v514_v16 = vpop.f32.mrf.mxu3 }
 0x115   :  { %v515_v59 = vadd.f32 %v514_v16, %v426_v55 }
 0x116   :  { %v387_v51 = vpop.f32.mrf.mxu0 }
 0x117   :  { %v388_v28 = vadd.f32 %v1444_v39, %v387_v51  ;;  %v476_v53 = vpop.f32.mrf.mxu1  ;;  %v549_v2 = vmax.f32 %v515_v59, 0.0 }
 0x119   :  { %v477_v56 = vadd.f32 %v476_v53, %v388_v28 }
 0x11b   :  { %v534_v60 = vmax.f32 %v477_v56, 0.0 }
 0x11c   :  { %v516_v62 = vpop.f32.mrf.mxu3 }
 0x11d   :  { %v517_v63 = vadd.f32 %v516_v62, %v428_v57  ;;  %v558_v0 = vpack.c.bf16 %v534_v60, %v533_v58 }
 0x11e   :  { %v390_v1 = vpop.f32.mrf.mxu0 }
 0x11f   :  { %v550_v3 = vmax.f32 %v517_v63, 0.0  ;;  %v479_v4 = vpop.f32.mrf.mxu1  ;;  %674 = vmatmul.bf16.gmra.mxu2 %v558_v0  ;;  %v391_v6 = vadd.f32 %v1444_v39, %v390_v1 }
 0x121   :  { %v566_v5 = vpack.c.bf16 %v550_v3, %v549_v2  ;;  %v480_v7 = vadd.f32 %v479_v4, %v391_v6 }
 0x123   :  { %714 = vmatmul.bf16.gmra.mxu3 %v566_v5  ;;  %v535_v10 = vmax.f32 %v480_v7, 0.0 }
 0x126   :  { %v392_v35 = vpop.f32.mrf.mxu0 }
 0x127   :  { %v393_v42 = vadd.f32 %v1444_v39, %v392_v35  ;;  %v481_v45 = vpop.f32.mrf.mxu1 }
 0x129   :  { %v482_v8 = vadd.f32 %v481_v45, %v393_v42 }
 0x12b   :  { %v536_v54 = vmax.f32 %v482_v8, 0.0 }
 0x12d   :  { %v559_v11 = vpack.c.bf16 %v536_v54, %v535_v10 }
 0x12e   :  { %v395_v12 = vpop.f32.mrf.mxu0 }
 0x12f   :  { %v484_v13 = vpop.f32.mrf.mxu1  ;;  %679 = vmatmul.bf16.gmra.mxu2 %v559_v11  ;;  %v396_v15 = vadd.f32 %v1444_v39, %v395_v12 }
 0x131   :  { %v485_v18 = vadd.f32 %v484_v13, %v396_v15 }
 0x132   :  { %v640_v14 = vpop.f32.mrf.mxu2 }
 0x133   :  { %v537_v23 = vmax.f32 %v485_v18, 0.0 }
 0x136   :  { %v397_v17 = vpop.f32.mrf.mxu0 }
 0x137   :  { %v398_v19 = vadd.f32 %v1444_v39, %v397_v17  ;;  %v486_v20 = vpop.f32.mrf.mxu1 }
 0x139   :  { %v487_v21 = vadd.f32 %v486_v20, %v398_v19 }
 0x13a   :  { %v642_v22 = vpop.f32.mrf.mxu2 }
 0x13b   :  { %v538_v24 = vmax.f32 %v487_v21, 0.0  ;;  %v1071_v25 = vpack.c.bf16 %v642_v22, %v640_v14 }
 0x13d   :  { %1072 = vst [vmem:[%s1590_s4] sm:$0xff] %v1071_v25   ;;  %v560_v26 = vpack.c.bf16 %v538_v24, %v537_v23 }
 0x13e   :  { %v400_v27 = vpop.f32.mrf.mxu0 }
 0x13f   :  { %v489_v61 = vpop.f32.mrf.mxu1  ;;  %684 = vmatmul.bf16.gmra.mxu2 %v560_v26  ;;  %v401_v30 = vadd.f32 %v1444_v39, %v400_v27 }
 0x141   :  { %v490_v31 = vadd.f32 %v489_v61, %v401_v30 }
 0x142   :  { %v645_v29 = vpop.f32.mrf.mxu2 }
 0x143   :  { %v539_v37 = vmax.f32 %v490_v31, 0.0 }
 0x146   :  { %v402_v9 = vpop.f32.mrf.mxu0 }
 0x147   :  { %v403_v32 = vadd.f32 %v1444_v39, %v402_v9  ;;  %v491_v33 = vpop.f32.mrf.mxu1 }
 0x149   :  { %v492_v34 = vadd.f32 %v491_v33, %v403_v32 }
 0x14a   :  { %v647_v36 = vpop.f32.mrf.mxu2 }
 0x14b   :  { %v540_v38 = vmax.f32 %v492_v34, 0.0  ;;  %v1076_v40 = vpack.c.bf16 %v647_v36, %v645_v29 }
 0x14d   :  { %1148 = vst [vmem:[%s1590_s4 + $0x8] sm:$0xff] %v1076_v40   ;;  %v561_v41 = vpack.c.bf16 %v540_v38, %v539_v37 }
 0x14e   :  { %v405_v43 = vpop.f32.mrf.mxu0 }
 0x14f   :  { %v494_v44 = vpop.f32.mrf.mxu1  ;;  %689 = vmatmul.bf16.gmra.mxu2 %v561_v41  ;;  %v406_v47 = vadd.f32 %v1444_v39, %v405_v43 }
 0x151   :  { %v495_v49 = vadd.f32 %v494_v44, %v406_v47 }
 0x152   :  { %v650_v46 = vpop.f32.mrf.mxu2 }
 0x153   :  { %v541_v28 = vmax.f32 %v495_v49, 0.0 }
 0x156   :  { %v407_v48 = vpop.f32.mrf.mxu0 }
 0x157   :  { %v408_v50 = vadd.f32 %v1444_v39, %v407_v48  ;;  %v496_v16 = vpop.f32.mrf.mxu1 }
 0x159   :  { %v497_v51 = vadd.f32 %v496_v16, %v408_v50 }
 0x15a   :  { %v652_v52 = vpop.f32.mrf.mxu2 }
 0x15b   :  { %v542_v53 = vmax.f32 %v497_v51, 0.0  ;;  %v1081_v55 = vpack.c.bf16 %v652_v52, %v650_v46 }
 0x15d   :  { %1149 = vst [vmem:[%s1590_s4 + $0x10] sm:$0xff] %v1081_v55   ;;  %v562_v56 = vpack.c.bf16 %v542_v53, %v541_v28 }
 0x15f   :  { %694 = vmatmul.bf16.gmra.mxu2 %v562_v56 }
 0x162   :  { %v655_v57 = vpop.f32.mrf.mxu2 }
 0x16a   :  { %v657_v58 = vpop.f32.mrf.mxu2 }
 0x16b   :  { %v1086_v59 = vpack.c.bf16 %v657_v58, %v655_v57 }
 0x16d   :  { %1150 = vst [vmem:[%s1590_s4 + $0x18] sm:$0xff] %v1086_v59  }
 0x172   :  { %v660_v39 = vpop.f32.mrf.mxu2 }
 0x176   :  { %v700_v60 = vpop.f32.mrf.mxu3 }
 0x17a   :  { %v662_v62 = vpop.f32.mrf.mxu2 }
 0x17b   :  { %v1091_v63 = vpack.c.bf16 %v662_v62, %v660_v39 }
 0x17d   :  { %1151 = vst [vmem:[%s1590_s4 + $0x20] sm:$0xff] %v1091_v63  }
 0x17e   :  { %v702_v0 = vpop.f32.mrf.mxu3 }
 0x17f   :  { %v1131_v1 = vpack.c.bf16 %v702_v0, %v700_v60 }
 0x181   :  { %1159 = vst [vmem:[%s1590_s4 + $0x60] sm:$0xff] %v1131_v1  }
 0x182   :  { %v665_v2 = vpop.f32.mrf.mxu2 }
 0x186   :  { %v705_v3 = vpop.f32.mrf.mxu3 }
 0x18a   :  { %v667_v4 = vpop.f32.mrf.mxu2 }
 0x18b   :  { %v1096_v5 = vpack.c.bf16 %v667_v4, %v665_v2 }
 0x18d   :  { %1152 = vst [vmem:[%s1590_s4 + $0x28] sm:$0xff] %v1096_v5  }
 0x18e   :  { %v707_v6 = vpop.f32.mrf.mxu3 }
 0x18f   :  { %v1136_v35 = vpack.c.bf16 %v707_v6, %v705_v3 }
 0x191   :  { %1160 = vst [vmem:[%s1590_s4 + $0x68] sm:$0xff] %v1136_v35  }
 0x192   :  { %v670_v7 = vpop.f32.mrf.mxu2 }
 0x196   :  { %v710_v42 = vpop.f32.mrf.mxu3 }
 0x19a   :  { %v672_v45 = vpop.f32.mrf.mxu2 }
 0x19b   :  { %v1101_v8 = vpack.c.bf16 %v672_v45, %v670_v7 }
 0x19d   :  { %1153 = vst [vmem:[%s1590_s4 + $0x30] sm:$0xff] %v1101_v8  }
 0x19e   :  { %v712_v10 = vpop.f32.mrf.mxu3 }
 0x19f   :  { %v1141_v54 = vpack.c.bf16 %v712_v10, %v710_v42 }
 0x1a1   :  { %1161 = vst [vmem:[%s1590_s4 + $0x70] sm:$0xff] %v1141_v54  }
 0x1a2   :  { %v675_v11 = vpop.f32.mrf.mxu2 }
 0x1a6   :  { %v715_v12 = vpop.f32.mrf.mxu3 }
 0x1aa   :  { %v677_v13 = vpop.f32.mrf.mxu2 }
 0x1ab   :  { %v1106_v14 = vpack.c.bf16 %v677_v13, %v675_v11 }
 0x1ad   :  { %1154 = vst [vmem:[%s1590_s4 + $0x38] sm:$0xff] %v1106_v14  }
 0x1ae   :  { %v717_v15 = vpop.f32.mrf.mxu3 }
 0x1af   :  { %v1146_v17 = vpack.c.bf16 %v717_v15, %v715_v12 }
 0x1b1   :  { %1162 = vst [vmem:[%s1590_s4 + $0x78] sm:$0xff] %v1146_v17  }
 0x1b2   :  { %v680_v18 = vpop.f32.mrf.mxu2 }
 0x1ba   :  { %v682_v19 = vpop.f32.mrf.mxu2 }
 0x1bb   :  { %v1111_v20 = vpack.c.bf16 %v682_v19, %v680_v18 }
 0x1bd   :  { %1155 = vst [vmem:[%s1590_s4 + $0x40] sm:$0xff] %v1111_v20  }
 0x1c2   :  { %v685_v21 = vpop.f32.mrf.mxu2 }
 0x1ca   :  { %v687_v22 = vpop.f32.mrf.mxu2 }
 0x1cb   :  { %v1116_v23 = vpack.c.bf16 %v687_v22, %v685_v21 }
 0x1cd   :  { %1156 = vst [vmem:[%s1590_s4 + $0x48] sm:$0xff] %v1116_v23  }
 0x1d2   :  { %v690_v24 = vpop.f32.mrf.mxu2 }
 0x1da   :  { %v692_v25 = vpop.f32.mrf.mxu2 }
 0x1db   :  { %v1121_v26 = vpack.c.bf16 %v692_v25, %v690_v24 }
 0x1dd   :  { %1157 = vst [vmem:[%s1590_s4 + $0x50] sm:$0xff] %v1121_v26  }
 0x1e2   :  { %v695_v27 = vpop.f32.mrf.mxu2 }
 0x1ea   :  { %v697_v61 = vpop.f32.mrf.mxu2 }
 0x1eb   :  { %v1126_v29 = vpack.c.bf16 %v697_v61, %v695_v27 }
 0x1ed   :  { %1158 = vst [vmem:[%s1590_s4 + $0x58] sm:$0xff] %v1126_v29  }

// kernel: gcn_forward.5
= control target key start
LH: loop header
LB: loop body
LE: loop exit
PB: predicated region body
PF: predicated region fallthrough
CT: control target
= control target key end

     0   :  { %s1202_s1 = inlined_call_operand.vmem [shape: bf16[256,128], index: 1, kind: input, shape index: {}]   ;;  %s1203_s2 = inlined_call_operand.vmem [shape: f32[1,128], index: 2, kind: input, shape index: {}]   ;;  %s1204_s0 = inlined_call_operand.vmem [shape: bf16[256,256], index: 0, kind: input, shape index: {}]   ;;  %s1205_s3 = inlined_call_operand.vmem [shape: f32[256,128], index: 3, kind: output, shape index: {}]  }
   0x1   :  { %v783_v0 = vld [vmem:[%s1202_s1 + $0x38] sm:$0xff]  ;;  %v782_v2 = vld [vmem:[%s1202_s1 + $0x30] sm:$0xff]  ;;  %v781_v4 = vld [vmem:[%s1202_s1 + $0x28] sm:$0xff] }
   0x2   :  { %v791_v1 = vld [vmem:[%s1202_s1 + $0x78] sm:$0xff]  ;;  %338 = vmatpush.bf16.msra.mxu0 %v783_v0  ;;  %792 = vmatpush.bf16.msra.mxu2 %v783_v0  ;;  %v790_v3 = vld [vmem:[%s1202_s1 + $0x70] sm:$0xff]  ;;  %v789_v5 = vld [vmem:[%s1202_s1 + $0x68] sm:$0xff] }
   0x3   :  { %427 = vmatpush.bf16.msra.mxu1 %v791_v1  ;;  %800 = vmatpush.bf16.msra.mxu3 %v791_v1  ;;  %v780_v6 = vld [vmem:[%s1202_s1 + $0x20] sm:$0xff]  ;;  %v779_v8 = vld [vmem:[%s1202_s1 + $0x18] sm:$0xff]  ;;  %v778_v10 = vld [vmem:[%s1202_s1 + $0x10] sm:$0xff] }
   0x4   :  { %v788_v7 = vld [vmem:[%s1202_s1 + $0x60] sm:$0xff]  ;;  %v787_v9 = vld [vmem:[%s1202_s1 + $0x58] sm:$0xff]  ;;  %v786_v11 = vld [vmem:[%s1202_s1 + $0x50] sm:$0xff] }
   0x5   :  { %v777_v12 = vld [vmem:[%s1202_s1 + $0x8] sm:$0xff]  ;;  %v776_v14 = vld [vmem:[%s1202_s1] sm:$0xff]  ;;  %v562_v28 = vld [vmem:[%s1204_s0 + $0x10] sm:$0xf] }
   0x6   :  { %339 = vmatpush.bf16.msra.mxu0 %v782_v2  ;;  %793 = vmatpush.bf16.msra.mxu2 %v782_v2  ;;  %v785_v13 = vld [vmem:[%s1202_s1 + $0x48] sm:$0xff]  ;;  %v784_v15 = vld [vmem:[%s1202_s1 + $0x40] sm:$0xff]  ;;  %v747_v29 = vld [vmem:[%s1204_s0 + $0x14] sm:$0xf0] }
   0x7   :  { %428 = vmatpush.bf16.msra.mxu1 %v790_v3  ;;  %801 = vmatpush.bf16.msra.mxu3 %v790_v3  ;;  %v554_v16 = vld [vmem:[%s1204_s0] sm:$0xf]  ;;  %v745_v17 = vld [vmem:[%s1204_s0 + $0x4] sm:$0xf0]  ;;  %v744_v20 = vld [vmem:[%s1204_s0 + $0x4] sm:$0xf]  ;;  %v563_v36 = vor.u32 %v747_v29, %v562_v28 }
   0x8   :  { %v618_v18 = vld [vmem:[%s1204_s0 + $0x80] sm:$0xf]  ;;  %v761_v19 = vld [vmem:[%s1204_s0 + $0x84] sm:$0xf0]  ;;  %v556_v21 = vld [vmem:[%s1204_s0 + $0x8] sm:$0xf0]  ;;  %v555_v24 = vor.u32 %v745_v17, %v554_v16 }
   0x9   :  { %v760_v22 = vld [vmem:[%s1204_s0 + $0x84] sm:$0xf]  ;;  %v620_v23 = vld [vmem:[%s1204_s0 + $0x88] sm:$0xf0]  ;;  %v619_v25 = vor.u32 %v761_v19, %v618_v18  ;;  %v559_v26 = vor.u32 %v744_v20, %v556_v21  ;;  %v626_v30 = vld [vmem:[%s1204_s0 + $0x90] sm:$0xf] }
   0xa   :  { %340 = vmatpush.bf16.msra.mxu0 %v781_v4  ;;  %794 = vmatpush.bf16.msra.mxu2 %v781_v4  ;;  %v623_v27 = vor.u32 %v760_v22, %v620_v23  ;;  %v763_v31 = vld [vmem:[%s1204_s0 + $0x94] sm:$0xf0]  ;;  %v746_v32 = vld [vmem:[%s1204_s0 + $0x14] sm:$0xf]  ;;  %v564_v33 = vld [vmem:[%s1204_s0 + $0x18] sm:$0xf0] }
   0xb   :  { %429 = vmatpush.bf16.msra.mxu1 %v789_v5  ;;  %802 = vmatpush.bf16.msra.mxu3 %v789_v5  ;;  %v762_v34 = vld [vmem:[%s1204_s0 + $0x94] sm:$0xf]  ;;  %v628_v35 = vld [vmem:[%s1204_s0 + $0x98] sm:$0xf0]  ;;  %v627_v37 = vor.u32 %v763_v31, %v626_v30  ;;  %v567_v38 = vor.u32 %v746_v32, %v564_v33  ;;  %v570_v40 = vld [vmem:[%s1204_s0 + $0x20] sm:$0xf] }
   0xc   :  { %v631_v39 = vor.u32 %v762_v34, %v628_v35  ;;  %v749_v41 = vld [vmem:[%s1204_s0 + $0x24] sm:$0xf0]  ;;  %v634_v42 = vld [vmem:[%s1204_s0 + $0xa0] sm:$0xf]  ;;  %v748_v44 = vld [vmem:[%s1204_s0 + $0x24] sm:$0xf] }
   0xd   :  { %v765_v43 = vld [vmem:[%s1204_s0 + $0xa4] sm:$0xf0]  ;;  %v572_v45 = vld [vmem:[%s1204_s0 + $0x28] sm:$0xf0]  ;;  %v764_v46 = vld [vmem:[%s1204_s0 + $0xa4] sm:$0xf]  ;;  %v571_v48 = vor.u32 %v749_v41, %v570_v40 }
   0xe   :  { %341 = vmatpush.bf16.msra.mxu0 %v780_v6  ;;  %795 = vmatpush.bf16.msra.mxu2 %v780_v6  ;;  %v636_v47 = vld [vmem:[%s1204_s0 + $0xa8] sm:$0xf0]  ;;  %v635_v49 = vor.u32 %v765_v43, %v634_v42  ;;  %v575_v50 = vor.u32 %v748_v44, %v572_v45  ;;  %v578_v52 = vld [vmem:[%s1204_s0 + $0x30] sm:$0xf]  ;;  %v751_v53 = vld [vmem:[%s1204_s0 + $0x34] sm:$0xf0] }
   0xf   :  { %430 = vmatpush.bf16.msra.mxu1 %v788_v7  ;;  %803 = vmatpush.bf16.msra.mxu3 %v788_v7  ;;  %v639_v51 = vor.u32 %v764_v46, %v636_v47  ;;  %v642_v54 = vld [vmem:[%s1204_s0 + $0xb0] sm:$0xf]  ;;  %v767_v55 = vld [vmem:[%s1204_s0 + $0xb4] sm:$0xf0]  ;;  %v750_v56 = vld [vmem:[%s1204_s0 + $0x34] sm:$0xf]  ;;  %v579_v60 = vor.u32 %v751_v53, %v578_v52 }
  0x10   :  { %v580_v57 = vld [vmem:[%s1204_s0 + $0x38] sm:$0xf0]  ;;  %v766_v58 = vld [vmem:[%s1204_s0 + $0xb4] sm:$0xf]  ;;  %v643_v61 = vor.u32 %v767_v55, %v642_v54  ;;  %v586_v0 = vld [vmem:[%s1204_s0 + $0x40] sm:$0xf] }
  0x11   :  { %v644_v59 = vld [vmem:[%s1204_s0 + $0xb8] sm:$0xf0]  ;;  %v583_v62 = vor.u32 %v750_v56, %v580_v57  ;;  %v753_v1 = vld [vmem:[%s1204_s0 + $0x44] sm:$0xf0]  ;;  %v650_v2 = vld [vmem:[%s1204_s0 + $0xc0] sm:$0xf] }
  0x12   :  { %342 = vmatpush.bf16.msra.mxu0 %v779_v8  ;;  %796 = vmatpush.bf16.msra.mxu2 %v779_v8  ;;  %v647_v63 = vor.u32 %v766_v58, %v644_v59  ;;  %v769_v3 = vld [vmem:[%s1204_s0 + $0xc4] sm:$0xf0]  ;;  %v752_v4 = vld [vmem:[%s1204_s0 + $0x44] sm:$0xf]  ;;  %v588_v5 = vld [vmem:[%s1204_s0 + $0x48] sm:$0xf0]  ;;  %v587_v8 = vor.u32 %v753_v1, %v586_v0 }
  0x13   :  { %431 = vmatpush.bf16.msra.mxu1 %v787_v9  ;;  %804 = vmatpush.bf16.msra.mxu3 %v787_v9  ;;  %v768_v6 = vld [vmem:[%s1204_s0 + $0xc4] sm:$0xf]  ;;  %v652_v7 = vld [vmem:[%s1204_s0 + $0xc8] sm:$0xf0]  ;;  %v651_v9 = vor.u32 %v769_v3, %v650_v2  ;;  %v754_v16 = vld [vmem:[%s1204_s0 + $0x54] sm:$0xf] }
  0x14   :  { %v596_v17 = vld [vmem:[%s1204_s0 + $0x58] sm:$0xf0]  ;;  %v770_v18 = vld [vmem:[%s1204_s0 + $0xd4] sm:$0xf]  ;;  %v756_v28 = vld [vmem:[%s1204_s0 + $0x64] sm:$0xf] }
  0x15   :  { %v660_v19 = vld [vmem:[%s1204_s0 + $0xd8] sm:$0xf0]  ;;  %v599_v22 = vor.u32 %v754_v16, %v596_v17  ;;  %v604_v29 = vld [vmem:[%s1204_s0 + $0x68] sm:$0xf0]  ;;  %v772_v30 = vld [vmem:[%s1204_s0 + $0xe4] sm:$0xf] }
  0x16   :  { %343 = vmatpush.bf16.msra.mxu0 %v778_v10  ;;  %797 = vmatpush.bf16.msra.mxu2 %v778_v10  ;;  %v591_v10 = vor.u32 %v752_v4, %v588_v5  ;;  %v663_v23 = vor.u32 %v770_v18, %v660_v19  ;;  %v668_v31 = vld [vmem:[%s1204_s0 + $0xe8] sm:$0xf0]  ;;  %v607_v34 = vor.u32 %v756_v28, %v604_v29  ;;  %v758_v40 = vld [vmem:[%s1204_s0 + $0x74] sm:$0xf]  ;;  %v612_v41 = vld [vmem:[%s1204_s0 + $0x78] sm:$0xf0] }
  0x17   :  { %432 = vmatpush.bf16.msra.mxu1 %v786_v11  ;;  %805 = vmatpush.bf16.msra.mxu3 %v786_v11  ;;  %v655_v11 = vor.u32 %v768_v6, %v652_v7  ;;  %v671_v35 = vor.u32 %v772_v30, %v668_v31  ;;  %v774_v42 = vld [vmem:[%s1204_s0 + $0xf4] sm:$0xf]  ;;  %v676_v43 = vld [vmem:[%s1204_s0 + $0xf8] sm:$0xf0]  ;;  %v615_v46 = vor.u32 %v758_v40, %v612_v41 }
  0x18   :  { %v679_v47 = vor.u32 %v774_v42, %v676_v43 }
  0x1a   :  { %344 = vmatpush.bf16.msra.mxu0 %v777_v12  ;;  %798 = vmatpush.bf16.msra.mxu2 %v777_v12  ;;  %v594_v12 = vld [vmem:[%s1204_s0 + $0x50] sm:$0xf] }
  0x1b   :  { %433 = vmatpush.bf16.msra.mxu1 %v785_v13  ;;  %806 = vmatpush.bf16.msra.mxu3 %v785_v13  ;;  %v755_v13 = vld [vmem:[%s1204_s0 + $0x54] sm:$0xf0] }
  0x1c   :  { %v595_v20 = vor.u32 %v755_v13, %v594_v12 }
  0x1e   :  { %345 = vmatpush.bf16.msra.mxu0 %v776_v14  ;;  %799 = vmatpush.bf16.msra.mxu2 %v776_v14  ;;  %v658_v14 = vld [vmem:[%s1204_s0 + $0xd0] sm:$0xf] }
  0x1f   :  { %434 = vmatpush.bf16.msra.mxu1 %v784_v15  ;;  %807 = vmatpush.bf16.msra.mxu3 %v784_v15  ;;  %v771_v15 = vld [vmem:[%s1204_s0 + $0xd4] sm:$0xf0] }
  0x20   :  { %v659_v21 = vor.u32 %v771_v15, %v658_v14 }
  0x21   :  { %346 = vmatmul.bf16.vlgmr.msra.gmra.mxu0 %v555_v24  ;;  %386 = vmatmul.bf16.vlgmr.msra.gmra.mxu2 %v619_v25  ;;  %v602_v24 = vld [vmem:[%s1204_s0 + $0x60] sm:$0xf]  ;;  %v757_v25 = vld [vmem:[%s1204_s0 + $0x64] sm:$0xf0] }
  0x22   :  { %435 = vmatmul.bf16.vlgmr.msra.gmra.mxu1 %v559_v26  ;;  %475 = vmatmul.bf16.vlgmr.msra.gmra.mxu3 %v623_v27  ;;  %v666_v26 = vld [vmem:[%s1204_s0 + $0xe0] sm:$0xf]  ;;  %v773_v27 = vld [vmem:[%s1204_s0 + $0xe4] sm:$0xf0]  ;;  %v603_v32 = vor.u32 %v757_v25, %v602_v24 }
  0x23   :  { %v667_v33 = vor.u32 %v773_v27, %v666_v26 }
  0x31   :  { %351 = vmatmul.bf16.gmra.mxu0 %v563_v36  ;;  %391 = vmatmul.bf16.gmra.mxu2 %v627_v37  ;;  %v610_v36 = vld [vmem:[%s1204_s0 + $0x70] sm:$0xf]  ;;  %v759_v37 = vld [vmem:[%s1204_s0 + $0x74] sm:$0xf0] }
  0x32   :  { %440 = vmatmul.bf16.gmra.mxu1 %v567_v38  ;;  %480 = vmatmul.bf16.gmra.mxu3 %v631_v39  ;;  %v674_v38 = vld [vmem:[%s1204_s0 + $0xf0] sm:$0xf]  ;;  %v775_v39 = vld [vmem:[%s1204_s0 + $0xf4] sm:$0xf0]  ;;  %v611_v44 = vor.u32 %v759_v37, %v610_v36 }
  0x33   :  { %v675_v45 = vor.u32 %v775_v39, %v674_v38 }
  0x41   :  { %356 = vmatmul.bf16.gmra.mxu0 %v571_v48  ;;  %396 = vmatmul.bf16.gmra.mxu2 %v635_v49  ;;  %v1072_v48 = vld [vmem:[%s1203_s2] ss:$0 sm:$0xff] }
  0x42   :  { %445 = vmatmul.bf16.gmra.mxu1 %v575_v50  ;;  %485 = vmatmul.bf16.gmra.mxu3 %v639_v51 }
  0x51   :  { %361 = vmatmul.bf16.gmra.mxu0 %v579_v60  ;;  %401 = vmatmul.bf16.gmra.mxu2 %v643_v61 }
  0x52   :  { %450 = vmatmul.bf16.gmra.mxu1 %v583_v62  ;;  %490 = vmatmul.bf16.gmra.mxu3 %v647_v63 }
  0x61   :  { %366 = vmatmul.bf16.gmra.mxu0 %v587_v8  ;;  %406 = vmatmul.bf16.gmra.mxu2 %v651_v9 }
  0x62   :  { %455 = vmatmul.bf16.gmra.mxu1 %v591_v10  ;;  %495 = vmatmul.bf16.gmra.mxu3 %v655_v11 }
  0x71   :  { %371 = vmatmul.bf16.gmra.mxu0 %v595_v20  ;;  %411 = vmatmul.bf16.gmra.mxu2 %v659_v21 }
  0x72   :  { %460 = vmatmul.bf16.gmra.mxu1 %v599_v22  ;;  %500 = vmatmul.bf16.gmra.mxu3 %v663_v23 }
  0x81   :  { %376 = vmatmul.bf16.gmra.mxu0 %v603_v32  ;;  %416 = vmatmul.bf16.gmra.mxu2 %v667_v33 }
  0x82   :  { %465 = vmatmul.bf16.gmra.mxu1 %v607_v34  ;;  %505 = vmatmul.bf16.gmra.mxu3 %v671_v35 }
  0x91   :  { %381 = vmatmul.bf16.gmra.mxu0 %v611_v44  ;;  %421 = vmatmul.bf16.gmra.mxu2 %v675_v45 }
  0x92   :  { %470 = vmatmul.bf16.gmra.mxu1 %v615_v46  ;;  %510 = vmatmul.bf16.gmra.mxu3 %v679_v47 }
  0x9e   :  { %v347_v49 = vpop.f32.mrf.mxu0 }
  0x9f   :  { %v348_v50 = vadd.f32 %v1072_v48, %v347_v49  ;;  %v436_v51 = vpop.f32.mrf.mxu1 }
  0xa1   :  { %v437_v52 = vadd.f32 %v436_v51, %v348_v50 }
  0xa3   :  { %516 = vst [vmem:[%s1205_s3] sm:$0xff] %v437_v52 }
  0xa4   :  { %v387_v53 = vpop.f32.mrf.mxu2 }
  0xa5   :  { %v388_v54 = vadd.f32 %v1072_v48, %v387_v53  ;;  %v476_v55 = vpop.f32.mrf.mxu3 }
  0xa6   :  { %v349_v56 = vpop.f32.mrf.mxu0 }
  0xa7   :  { %v477_v57 = vadd.f32 %v476_v55, %v388_v54  ;;  %v350_v58 = vadd.f32 %v1072_v48, %v349_v56  ;;  %v438_v59 = vpop.f32.mrf.mxu1 }
  0xa9   :  { %532 = vst [vmem:[%s1205_s3 + $0x80] sm:$0xff] %v477_v57  ;;  %v439_v60 = vadd.f32 %v438_v59, %v350_v58 }
  0xab   :  { %517 = vst [vmem:[%s1205_s3 + $0x8] sm:$0xff] %v439_v60 }
  0xac   :  { %v389_v61 = vpop.f32.mrf.mxu2 }
  0xad   :  { %v390_v62 = vadd.f32 %v1072_v48, %v389_v61  ;;  %v478_v63 = vpop.f32.mrf.mxu3 }
  0xae   :  { %v352_v0 = vpop.f32.mrf.mxu0 }
  0xaf   :  { %v479_v1 = vadd.f32 %v478_v63, %v390_v62  ;;  %v353_v2 = vadd.f32 %v1072_v48, %v352_v0  ;;  %v441_v3 = vpop.f32.mrf.mxu1 }
  0xb1   :  { %533 = vst [vmem:[%s1205_s3 + $0x88] sm:$0xff] %v479_v1  ;;  %v442_v4 = vadd.f32 %v441_v3, %v353_v2 }
  0xb3   :  { %518 = vst [vmem:[%s1205_s3 + $0x10] sm:$0xff] %v442_v4 }
  0xb4   :  { %v392_v5 = vpop.f32.mrf.mxu2 }
  0xb5   :  { %v393_v6 = vadd.f32 %v1072_v48, %v392_v5  ;;  %v481_v7 = vpop.f32.mrf.mxu3 }
  0xb6   :  { %v354_v8 = vpop.f32.mrf.mxu0 }
  0xb7   :  { %v482_v9 = vadd.f32 %v481_v7, %v393_v6  ;;  %v355_v10 = vadd.f32 %v1072_v48, %v354_v8  ;;  %v443_v11 = vpop.f32.mrf.mxu1 }
  0xb9   :  { %534 = vst [vmem:[%s1205_s3 + $0x90] sm:$0xff] %v482_v9  ;;  %v444_v12 = vadd.f32 %v443_v11, %v355_v10 }
  0xbb   :  { %519 = vst [vmem:[%s1205_s3 + $0x18] sm:$0xff] %v444_v12 }
  0xbc   :  { %v394_v13 = vpop.f32.mrf.mxu2 }
  0xbd   :  { %v395_v14 = vadd.f32 %v1072_v48, %v394_v13  ;;  %v483_v15 = vpop.f32.mrf.mxu3 }
  0xbe   :  { %v357_v16 = vpop.f32.mrf.mxu0 }
  0xbf   :  { %v484_v17 = vadd.f32 %v483_v15, %v395_v14  ;;  %v358_v18 = vadd.f32 %v1072_v48, %v357_v16  ;;  %v446_v19 = vpop.f32.mrf.mxu1 }
  0xc1   :  { %535 = vst [vmem:[%s1205_s3 + $0x98] sm:$0xff] %v484_v17  ;;  %v447_v20 = vadd.f32 %v446_v19, %v358_v18 }
  0xc3   :  { %520 = vst [vmem:[%s1205_s3 + $0x20] sm:$0xff] %v447_v20 }
  0xc4   :  { %v397_v21 = vpop.f32.mrf.mxu2 }
  0xc5   :  { %v398_v22 = vadd.f32 %v1072_v48, %v397_v21  ;;  %v486_v23 = vpop.f32.mrf.mxu3 }
  0xc6   :  { %v359_v24 = vpop.f32.mrf.mxu0 }
  0xc7   :  { %v487_v25 = vadd.f32 %v486_v23, %v398_v22  ;;  %v360_v26 = vadd.f32 %v1072_v48, %v359_v24  ;;  %v448_v27 = vpop.f32.mrf.mxu1 }
  0xc9   :  { %536 = vst [vmem:[%s1205_s3 + $0xa0] sm:$0xff] %v487_v25  ;;  %v449_v28 = vadd.f32 %v448_v27, %v360_v26 }
  0xcb   :  { %521 = vst [vmem:[%s1205_s3 + $0x28] sm:$0xff] %v449_v28 }
  0xcc   :  { %v399_v29 = vpop.f32.mrf.mxu2 }
  0xcd   :  { %v400_v30 = vadd.f32 %v1072_v48, %v399_v29  ;;  %v488_v31 = vpop.f32.mrf.mxu3 }
  0xce   :  { %v362_v32 = vpop.f32.mrf.mxu0 }
  0xcf   :  { %v489_v33 = vadd.f32 %v488_v31, %v400_v30  ;;  %v363_v34 = vadd.f32 %v1072_v48, %v362_v32  ;;  %v451_v35 = vpop.f32.mrf.mxu1 }
  0xd1   :  { %537 = vst [vmem:[%s1205_s3 + $0xa8] sm:$0xff] %v489_v33  ;;  %v452_v36 = vadd.f32 %v451_v35, %v363_v34 }
  0xd3   :  { %522 = vst [vmem:[%s1205_s3 + $0x30] sm:$0xff] %v452_v36 }
  0xd4   :  { %v402_v37 = vpop.f32.mrf.mxu2 }
  0xd5   :  { %v403_v38 = vadd.f32 %v1072_v48, %v402_v37  ;;  %v491_v39 = vpop.f32.mrf.mxu3 }
  0xd6   :  { %v364_v40 = vpop.f32.mrf.mxu0 }
  0xd7   :  { %v492_v41 = vadd.f32 %v491_v39, %v403_v38  ;;  %v365_v42 = vadd.f32 %v1072_v48, %v364_v40  ;;  %v453_v43 = vpop.f32.mrf.mxu1 }
  0xd9   :  { %538 = vst [vmem:[%s1205_s3 + $0xb0] sm:$0xff] %v492_v41  ;;  %v454_v44 = vadd.f32 %v453_v43, %v365_v42 }
  0xdb   :  { %523 = vst [vmem:[%s1205_s3 + $0x38] sm:$0xff] %v454_v44 }
  0xdc   :  { %v404_v45 = vpop.f32.mrf.mxu2 }
  0xdd   :  { %v405_v46 = vadd.f32 %v1072_v48, %v404_v45  ;;  %v493_v47 = vpop.f32.mrf.mxu3 }
  0xde   :  { %v367_v49 = vpop.f32.mrf.mxu0 }
  0xdf   :  { %v494_v50 = vadd.f32 %v493_v47, %v405_v46  ;;  %v368_v51 = vadd.f32 %v1072_v48, %v367_v49  ;;  %v456_v52 = vpop.f32.mrf.mxu1 }
  0xe1   :  { %539 = vst [vmem:[%s1205_s3 + $0xb8] sm:$0xff] %v494_v50  ;;  %v457_v53 = vadd.f32 %v456_v52, %v368_v51 }
  0xe3   :  { %524 = vst [vmem:[%s1205_s3 + $0x40] sm:$0xff] %v457_v53 }
  0xe4   :  { %v407_v54 = vpop.f32.mrf.mxu2 }
  0xe5   :  { %v408_v55 = vadd.f32 %v1072_v48, %v407_v54  ;;  %v496_v56 = vpop.f32.mrf.mxu3 }
  0xe6   :  { %v369_v57 = vpop.f32.mrf.mxu0 }
  0xe7   :  { %v497_v58 = vadd.f32 %v496_v56, %v408_v55  ;;  %v370_v59 = vadd.f32 %v1072_v48, %v369_v57  ;;  %v458_v60 = vpop.f32.mrf.mxu1 }
  0xe9   :  { %540 = vst [vmem:[%s1205_s3 + $0xc0] sm:$0xff] %v497_v58  ;;  %v459_v61 = vadd.f32 %v458_v60, %v370_v59 }
  0xeb   :  { %525 = vst [vmem:[%s1205_s3 + $0x48] sm:$0xff] %v459_v61 }
  0xec   :  { %v409_v62 = vpop.f32.mrf.mxu2 }
  0xed   :  { %v410_v63 = vadd.f32 %v1072_v48, %v409_v62  ;;  %v498_v0 = vpop.f32.mrf.mxu3 }
  0xee   :  { %v372_v1 = vpop.f32.mrf.mxu0 }
  0xef   :  { %v499_v2 = vadd.f32 %v498_v0, %v410_v63  ;;  %v373_v3 = vadd.f32 %v1072_v48, %v372_v1  ;;  %v461_v4 = vpop.f32.mrf.mxu1 }
  0xf1   :  { %541 = vst [vmem:[%s1205_s3 + $0xc8] sm:$0xff] %v499_v2  ;;  %v462_v5 = vadd.f32 %v461_v4, %v373_v3 }
  0xf3   :  { %526 = vst [vmem:[%s1205_s3 + $0x50] sm:$0xff] %v462_v5 }
  0xf4   :  { %v412_v6 = vpop.f32.mrf.mxu2 }
  0xf5   :  { %v413_v7 = vadd.f32 %v1072_v48, %v412_v6  ;;  %v501_v8 = vpop.f32.mrf.mxu3 }
  0xf6   :  { %v374_v9 = vpop.f32.mrf.mxu0 }
  0xf7   :  { %v502_v10 = vadd.f32 %v501_v8, %v413_v7  ;;  %v375_v11 = vadd.f32 %v1072_v48, %v374_v9  ;;  %v463_v12 = vpop.f32.mrf.mxu1 }
  0xf9   :  { %542 = vst [vmem:[%s1205_s3 + $0xd0] sm:$0xff] %v502_v10  ;;  %v464_v13 = vadd.f32 %v463_v12, %v375_v11 }
  0xfb   :  { %527 = vst [vmem:[%s1205_s3 + $0x58] sm:$0xff] %v464_v13 }
  0xfc   :  { %v414_v14 = vpop.f32.mrf.mxu2 }
  0xfd   :  { %v415_v15 = vadd.f32 %v1072_v48, %v414_v14  ;;  %v503_v16 = vpop.f32.mrf.mxu3 }
  0xfe   :  { %v377_v17 = vpop.f32.mrf.mxu0 }
  0xff   :  { %v504_v18 = vadd.f32 %v503_v16, %v415_v15  ;;  %v378_v19 = vadd.f32 %v1072_v48, %v377_v17  ;;  %v466_v20 = vpop.f32.mrf.mxu1 }
 0x101   :  { %543 = vst [vmem:[%s1205_s3 + $0xd8] sm:$0xff] %v504_v18  ;;  %v467_v21 = vadd.f32 %v466_v20, %v378_v19 }
 0x103   :  { %528 = vst [vmem:[%s1205_s3 + $0x60] sm:$0xff] %v467_v21 }
 0x104   :  { %v417_v22 = vpop.f32.mrf.mxu2 }
 0x105   :  { %v418_v23 = vadd.f32 %v1072_v48, %v417_v22  ;;  %v506_v24 = vpop.f32.mrf.mxu3 }
 0x106   :  { %v379_v25 = vpop.f32.mrf.mxu0 }
 0x107   :  { %v507_v26 = vadd.f32 %v506_v24, %v418_v23  ;;  %v380_v27 = vadd.f32 %v1072_v48, %v379_v25  ;;  %v468_v28 = vpop.f32.mrf.mxu1 }
 0x109   :  { %544 = vst [vmem:[%s1205_s3 + $0xe0] sm:$0xff] %v507_v26  ;;  %v469_v29 = vadd.f32 %v468_v28, %v380_v27 }
 0x10b   :  { %529 = vst [vmem:[%s1205_s3 + $0x68] sm:$0xff] %v469_v29 }
 0x10c   :  { %v419_v30 = vpop.f32.mrf.mxu2 }
 0x10d   :  { %v420_v31 = vadd.f32 %v1072_v48, %v419_v30  ;;  %v508_v32 = vpop.f32.mrf.mxu3 }
 0x10e   :  { %v382_v33 = vpop.f32.mrf.mxu0 }
 0x10f   :  { %v509_v34 = vadd.f32 %v508_v32, %v420_v31  ;;  %v383_v35 = vadd.f32 %v1072_v48, %v382_v33  ;;  %v471_v36 = vpop.f32.mrf.mxu1 }
 0x111   :  { %545 = vst [vmem:[%s1205_s3 + $0xe8] sm:$0xff] %v509_v34  ;;  %v472_v37 = vadd.f32 %v471_v36, %v383_v35 }
 0x113   :  { %530 = vst [vmem:[%s1205_s3 + $0x70] sm:$0xff] %v472_v37 }
 0x114   :  { %v422_v38 = vpop.f32.mrf.mxu2 }
 0x115   :  { %v423_v39 = vadd.f32 %v1072_v48, %v422_v38  ;;  %v511_v40 = vpop.f32.mrf.mxu3 }
 0x116   :  { %v384_v41 = vpop.f32.mrf.mxu0 }
 0x117   :  { %v512_v42 = vadd.f32 %v511_v40, %v423_v39  ;;  %v385_v43 = vadd.f32 %v1072_v48, %v384_v41  ;;  %v473_v44 = vpop.f32.mrf.mxu1 }
 0x119   :  { %546 = vst [vmem:[%s1205_s3 + $0xf0] sm:$0xff] %v512_v42  ;;  %v474_v45 = vadd.f32 %v473_v44, %v385_v43 }
 0x11b   :  { %531 = vst [vmem:[%s1205_s3 + $0x78] sm:$0xff] %v474_v45 }
 0x11c   :  { %v424_v46 = vpop.f32.mrf.mxu2 }
 0x11d   :  { %v425_v47 = vadd.f32 %v1072_v48, %v424_v46  ;;  %v513_v49 = vpop.f32.mrf.mxu3 }
 0x11f   :  { %v514_v50 = vadd.f32 %v513_v49, %v425_v47 }
 0x121   :  { %547 = vst [vmem:[%s1205_s3 + $0xf8] sm:$0xff] %v514_v50 }

</bundles_post_ra>
